<compile_context>
chip_gen: v5e
topology: v5e:2x2
jax: 0.10.0
libtpu: 0.0.40
codegen_flags: <defaults>
</compile_context>

<pallas_src>
import functools

import jax
import jax.numpy as jnp
from jax.experimental import pallas as pl
from jax.experimental.pallas import tpu as pltpu

NUM_INPUT = 784     # 28*28, fixed by the module's input.view(-1, 784)
LANE = 128          # TPU lane width


def _round_up(x, m):
    return (x + m - 1) // m * m


def _mlp_kernel(x_ref, w1t_ref, b1_ref, w2t_ref, b2_ref, w3t_ref, b3_ref, o_ref):
    # x_ref: (TB, 784) bf16; wKt_ref: (in, out) bf16; bK_ref: (1, out) f32; o_ref: (TB, O_pad) f32.
    x = x_ref[...]
    h1 = jnp.dot(x, w1t_ref[...], preferred_element_type=jnp.float32) + b1_ref[...]
    h2 = jnp.dot(h1.astype(w2t_ref.dtype), w2t_ref[...],
                 preferred_element_type=jnp.float32) + b2_ref[...]
    out = jnp.dot(h2.astype(w3t_ref.dtype), w3t_ref[...],
                  preferred_element_type=jnp.float32) + b3_ref[...]
    o_ref[...] = out.astype(o_ref.dtype)


def prepare_params(w1, b1, w2, b2, w3, b3):
    """One-time glue (outside the per-call path): PyTorch (out,in) weights ->
    (in,out) bf16 MXU layout; last layer zero-padded to a lane-dense width."""
    H1, H2, O = w1.shape[0], w2.shape[0], w3.shape[0]
    o_pad = _round_up(max(O, LANE), LANE)

    w1t = w1.T.astype(jnp.bfloat16)                               # (784, H1)
    w2t = w2.T.astype(jnp.bfloat16)                               # (H1, H2)
    w3t = jnp.zeros((H2, o_pad), jnp.bfloat16).at[:, :O].set(w3.T.astype(jnp.bfloat16))
    b1r = b1.reshape(1, H1).astype(jnp.float32)
    b2r = b2.reshape(1, H2).astype(jnp.float32)
    b3r = jnp.zeros((1, o_pad), jnp.float32).at[:, :O].set(b3.astype(jnp.float32))
    return w1t, b1r, w2t, b2r, w3t, b3r


@functools.partial(jax.jit, static_argnames=("num_output", "tile_b"))
def mm_forward(x_img, w1t, b1r, w2t, b2r, w3t, b3r, *, num_output, tile_b=128):
    # Flatten NCHW -> (N, 784) row-major (same as torch .view), pad batch to a
    # tile multiple, and feed the MXU bf16 operands.
    x = x_img.reshape(-1, NUM_INPUT)
    n = x.shape[0]
    n_pad = _round_up(n, tile_b)
    if n_pad != n:
        x = jnp.pad(x, ((0, n_pad - n), (0, 0)))
    x = x.astype(jnp.bfloat16)

    H1 = w1t.shape[1]
    H2 = w2t.shape[1]
    o_pad = w3t.shape[1]
    grid = (n_pad // tile_b,)

    flops = 2 * n_pad * (NUM_INPUT * H1 + H1 * H2 + H2 * o_pad)
    bytes_accessed = (
        n_pad * NUM_INPUT * 2                                   # x (bf16)
        + (NUM_INPUT * H1 + H1 * H2 + H2 * o_pad) * 2           # weights (bf16)
        + (H1 + H2 + o_pad) * 4                                 # biases (f32)
        + n_pad * o_pad * 4                                     # output (f32)
    )

    out = pl.pallas_call(
        _mlp_kernel,
        out_shape=jax.ShapeDtypeStruct((n_pad, o_pad), jnp.float32),
        grid_spec=pl.GridSpec(
            grid=grid,
            in_specs=[
                pl.BlockSpec((tile_b, NUM_INPUT), lambda i: (i, 0)),  # x tile over batch
                pl.BlockSpec((NUM_INPUT, H1), lambda i: (0, 0)),      # W1^T (resident)
                pl.BlockSpec((1, H1), lambda i: (0, 0)),              # b1
                pl.BlockSpec((H1, H2), lambda i: (0, 0)),             # W2^T
                pl.BlockSpec((1, H2), lambda i: (0, 0)),              # b2
                pl.BlockSpec((H2, o_pad), lambda i: (0, 0)),          # W3^T (lane-padded)
                pl.BlockSpec((1, o_pad), lambda i: (0, 0)),           # b3 (lane-padded)
            ],
            out_specs=pl.BlockSpec((tile_b, o_pad), lambda i: (i, 0)),
        ),
        compiler_params=pltpu.CompilerParams(
            dimension_semantics=("parallel",),
        ),
        cost_estimate=pl.CostEstimate(
            flops=flops, transcendentals=0, bytes_accessed=bytes_accessed),
    )(x, w1t, b1r, w2t, b2r, w3t, b3r)

    return out[:n, :num_output]


def _init_linear(key, out_features, in_features):
    # Deterministic PyTorch-like init: U(-1/sqrt(fan_in), 1/sqrt(fan_in))
    kw, kb = jax.random.split(key)
    bound = 1.0 / jnp.sqrt(jnp.float32(in_features))
    w = jax.random.uniform(kw, (out_features, in_features), jnp.float32, -bound, bound)
    b = jax.random.uniform(kb, (out_features,), jnp.float32, -bound, bound)
    return w, b


if __name__ == "__main__":
    # Shapes implied by the module: num_input=784 (28x28 NCHW images), two hiddens, 10 outputs.
    num_input, num_hidden1, num_hidden2, num_output = 784, 256, 128, 10
    batch = 256      # 2 grid steps of 128 rows -> both v7x TensorCores have work
    tile_b = 128

    key = jax.random.PRNGKey(0)
    k_x, k1, k2, k3 = jax.random.split(key, 4)

    x = jax.random.normal(k_x, (batch, 1, 28, 28), jnp.float32)  # NCHW
    w1, b1 = _init_linear(k1, num_hidden1, num_input)
    w2, b2 = _init_linear(k2, num_hidden2, num_hidden1)
    w3, b3 = _init_linear(k3, num_output, num_hidden2)

    params = prepare_params(w1, b1, w2, b2, w3, b3)
    out = mm_forward(x, *params, num_output=num_output, tile_b=tile_b)
    out = jax.block_until_ready(out)

    # Reference (plain JAX) with the same bf16 operand rounding the kernel uses
    # (accumulation in f32, activations re-rounded to bf16 between layers).
    def _bf(v):
        return v.astype(jnp.bfloat16).astype(jnp.float32)

    xf = _bf(x.reshape(-1, 784))
    h1 = xf @ _bf(w1).T + b1
    h2 = _bf(h1) @ _bf(w2).T + b2
    ref = _bf(h2) @ _bf(w3).T + b3

    assert out.shape == (batch, num_output)
    assert jnp.allclose(out, ref, atol=2e-3, rtol=2e-3), "mismatch vs reference"

    print("KERNEL_OK")
</pallas_src>

<mosaic_0001>
module attributes {stable_mosaic.version = 11 : i64} {
  func.func @_mlp_kernel(%arg0: i32, %arg1: memref<128x784xbf16, #tpu.memory_space<vmem>>, %arg2: memref<784x256xbf16, #tpu.memory_space<vmem>>, %arg3: memref<1x256xf32, #tpu.memory_space<vmem>>, %arg4: memref<256x128xbf16, #tpu.memory_space<vmem>>, %arg5: memref<1x128xf32, #tpu.memory_space<vmem>>, %arg6: memref<128x128xbf16, #tpu.memory_space<vmem>>, %arg7: memref<1x128xf32, #tpu.memory_space<vmem>>, %arg8: memref<128x128xf32, #tpu.memory_space<vmem>>) attributes {dimension_semantics = [#tpu.dimension_semantics<parallel>], iteration_bounds = array<i64: 2>, scalar_prefetch = 0 : i64, scratch_operands = 0 : i64, tpu.core_type = #tpu.core_type<tc>, window_params = [{transform_indices = @transform_0, window_bounds = array<i64: 128, 784>}, {pipeline_mode = #tpu.pipeline_mode<synchronous>, transform_indices = @transform_1, window_bounds = array<i64: 784, 256>}, {pipeline_mode = #tpu.pipeline_mode<synchronous>, transform_indices = @transform_2, window_bounds = array<i64: 1, 256>}, {pipeline_mode = #tpu.pipeline_mode<synchronous>, transform_indices = @transform_3, window_bounds = array<i64: 256, 128>}, {pipeline_mode = #tpu.pipeline_mode<synchronous>, transform_indices = @transform_4, window_bounds = array<i64: 1, 128>}, {pipeline_mode = #tpu.pipeline_mode<synchronous>, transform_indices = @transform_5, window_bounds = array<i64: 128, 128>}, {pipeline_mode = #tpu.pipeline_mode<synchronous>, transform_indices = @transform_6, window_bounds = array<i64: 1, 128>}, {transform_indices = @transform_7, window_bounds = array<i64: 128, 128>}]} {
    %c0 = arith.constant 0 : index
    %c0_0 = arith.constant 0 : index
    %0 = vector.load %arg1[%c0, %c0_0] : memref<128x784xbf16, #tpu.memory_space<vmem>>, vector<128x784xbf16>
    %c0_1 = arith.constant 0 : index
    %c0_2 = arith.constant 0 : index
    %1 = vector.load %arg2[%c0_1, %c0_2] : memref<784x256xbf16, #tpu.memory_space<vmem>>, vector<784x256xbf16>
    %cst = arith.constant dense<0.000000e+00> : vector<128x256xf32>
    %2 = tpu.matmul %0, %1, %cst {dimension_numbers = #tpu.dot_dimension_numbers<[1], [0], [0], [1], [0, 0, 1, 1], [], []>} : vector<128x784xbf16>, vector<784x256xbf16>, vector<128x256xf32> -> vector<128x256xf32>
    %c0_3 = arith.constant 0 : index
    %c0_4 = arith.constant 0 : index
    %3 = vector.load %arg3[%c0_3, %c0_4] : memref<1x256xf32, #tpu.memory_space<vmem>>, vector<1x256xf32>
    %4 = vector.broadcast %3 : vector<1x256xf32> to vector<128x256xf32>
    %5 = arith.addf %2, %4 : vector<128x256xf32>
    %6 = arith.truncf %5 : vector<128x256xf32> to vector<128x256xbf16>
    %c0_5 = arith.constant 0 : index
    %c0_6 = arith.constant 0 : index
    %7 = vector.load %arg4[%c0_5, %c0_6] : memref<256x128xbf16, #tpu.memory_space<vmem>>, vector<256x128xbf16>
    %cst_7 = arith.constant dense<0.000000e+00> : vector<128x128xf32>
    %8 = tpu.matmul %6, %7, %cst_7 {dimension_numbers = #tpu.dot_dimension_numbers<[1], [0], [0], [1], [0, 0, 1, 1], [], []>} : vector<128x256xbf16>, vector<256x128xbf16>, vector<128x128xf32> -> vector<128x128xf32>
    %c0_8 = arith.constant 0 : index
    %c0_9 = arith.constant 0 : index
    %9 = vector.load %arg5[%c0_8, %c0_9] : memref<1x128xf32, #tpu.memory_space<vmem>>, vector<1x128xf32>
    %10 = vector.broadcast %9 : vector<1x128xf32> to vector<128x128xf32>
    %11 = arith.addf %8, %10 : vector<128x128xf32>
    %12 = arith.truncf %11 : vector<128x128xf32> to vector<128x128xbf16>
    %c0_10 = arith.constant 0 : index
    %c0_11 = arith.constant 0 : index
    %13 = vector.load %arg6[%c0_10, %c0_11] : memref<128x128xbf16, #tpu.memory_space<vmem>>, vector<128x128xbf16>
    %cst_12 = arith.constant dense<0.000000e+00> : vector<128x128xf32>
    %14 = tpu.matmul %12, %13, %cst_12 {dimension_numbers = #tpu.dot_dimension_numbers<[1], [0], [0], [1], [0, 0, 1, 1], [], []>} : vector<128x128xbf16>, vector<128x128xbf16>, vector<128x128xf32> -> vector<128x128xf32>
    %c0_13 = arith.constant 0 : index
    %c0_14 = arith.constant 0 : index
    %15 = vector.load %arg7[%c0_13, %c0_14] : memref<1x128xf32, #tpu.memory_space<vmem>>, vector<1x128xf32>
    %16 = vector.broadcast %15 : vector<1x128xf32> to vector<128x128xf32>
    %17 = arith.addf %14, %16 : vector<128x128xf32>
    %c0_15 = arith.constant 0 : index
    %c0_16 = arith.constant 0 : index
    %18 = vector.load %arg8[%c0_15, %c0_16] : memref<128x128xf32, #tpu.memory_space<vmem>>, vector<128x128xf32>
    tpu.vector_store %arg8[%c0_15, %c0_16], %17 {strides = array<i32>} : memref<128x128xf32, #tpu.memory_space<vmem>>, vector<128x128xf32>,
    return
  }
  func.func @transform_0(%arg0: i32) -> (i32, i32) {
    %c0_i32 = arith.constant 0 : i32
    %c0_i32_0 = arith.constant 0 : i32
    return %arg0, %c0_i32 : i32, i32
  }
  func.func @transform_1(%arg0: i32) -> (i32, i32) {
    %c0_i32 = arith.constant 0 : i32
    %c0_i32_0 = arith.constant 0 : i32
    %c0_i32_1 = arith.constant 0 : i32
    return %c0_i32, %c0_i32_0 : i32, i32
  }
  func.func @transform_2(%arg0: i32) -> (i32, i32) {
    %c0_i32 = arith.constant 0 : i32
    %c0_i32_0 = arith.constant 0 : i32
    %c0_i32_1 = arith.constant 0 : i32
    return %c0_i32, %c0_i32_0 : i32, i32
  }
  func.func @transform_3(%arg0: i32) -> (i32, i32) {
    %c0_i32 = arith.constant 0 : i32
    %c0_i32_0 = arith.constant 0 : i32
    %c0_i32_1 = arith.constant 0 : i32
    return %c0_i32, %c0_i32_0 : i32, i32
  }
  func.func @transform_4(%arg0: i32) -> (i32, i32) {
    %c0_i32 = arith.constant 0 : i32
    %c0_i32_0 = arith.constant 0 : i32
    %c0_i32_1 = arith.constant 0 : i32
    return %c0_i32, %c0_i32_0 : i32, i32
  }
  func.func @transform_5(%arg0: i32) -> (i32, i32) {
    %c0_i32 = arith.constant 0 : i32
    %c0_i32_0 = arith.constant 0 : i32
    %c0_i32_1 = arith.constant 0 : i32
    return %c0_i32, %c0_i32_0 : i32, i32
  }
  func.func @transform_6(%arg0: i32) -> (i32, i32) {
    %c0_i32 = arith.constant 0 : i32
    %c0_i32_0 = arith.constant 0 : i32
    %c0_i32_1 = arith.constant 0 : i32
    return %c0_i32, %c0_i32_0 : i32, i32
  }
  func.func @transform_7(%arg0: i32) -> (i32, i32) {
    %c0_i32 = arith.constant 0 : i32
    %c0_i32_0 = arith.constant 0 : i32
    return %arg0, %c0_i32 : i32, i32
  }
}

</mosaic_0001>

<bundles_post_ra>
// kernel: mm_forward.1
= control target key start
LH: loop header
LB: loop body
LE: loop exit
PB: predicated region body
PF: predicated region fallthrough
CT: control target
= control target key end

     0   :  { %s3378_s24 = smov 0   ;;  %s4771_s0 = inlined_call_operand.vmem [shape: bf16[256,784], index: 0, kind: input, shape index: {}]   ;;  %s4772_s1 = inlined_call_operand.vmem [shape: bf16[784,256], index: 1, kind: input, shape index: {}]   ;;  %s4773_s2 = inlined_call_operand.vmem [shape: f32[1,256], index: 2, kind: input, shape index: {}]   ;;  %s4774_s3 = inlined_call_operand.vmem [shape: bf16[256,128], index: 3, kind: input, shape index: {}]   ;;  %s4775_s4 = inlined_call_operand.vmem [shape: f32[1,128], index: 4, kind: input, shape index: {}]   ;;  %s4776_s5 = inlined_call_operand.vmem [shape: bf16[128,128], index: 5, kind: input, shape index: {}]   ;;  %s4777_s6 = inlined_call_operand.vmem [shape: f32[1,128], index: 6, kind: input, shape index: {}]   ;;  %s4778_s7 = inlined_call_operand.vmem [shape: f32[256,128], index: 7, kind: output, shape index: {}]  }
   0x1 LB: > { %s2378_s25 = sadd.s32 4294967295, %s3336_s24   ;;  %p2382_p0 = scmp.ge.s32.totalorder %s3336_s24, 1  ;;  %s3336_s24 = sphi %s3378_s24, %s17_s24  }
   0x2   : > { %p239_p1 = scmp.lt.s32.totalorder %s3336_s24, 3 }
   0x4   : > { %p240_p2 = pnand %p2382_p0, %p239_p1 }
   0x6   : > { %243 = sbr.rel (%p240_p2) target bundleno = 992 (0x3e0), region = 48 }
   0xb   : > { %v2669_v0 = vld [vmem:[%s4772_s1 + $0x70] sm:$0xf]  ;;  %v3188_v1 = vld [vmem:[%s4772_s1 + $0x74] sm:$0xf0]  ;;  %v2661_v2 = vld [vmem:[%s4772_s1 + $0x60] sm:$0xf] }
   0xc   : > { %v2670_v3 = vor.u32 %v3188_v1, %v2669_v0  ;;  %v3186_v4 = vld [vmem:[%s4772_s1 + $0x64] sm:$0xf0]  ;;  %v2653_v6 = vld [vmem:[%s4772_s1 + $0x50] sm:$0xf]  ;;  %v3184_v7 = vld [vmem:[%s4772_s1 + $0x54] sm:$0xf0] }
   0xd   : > { %v2662_v5 = vor.u32 %v3186_v4, %v2661_v2  ;;  %v2654_v8 = vor.u32 %v3184_v7, %v2653_v6  ;;  %v2645_v9 = vld [vmem:[%s4772_s1 + $0x40] sm:$0xf]  ;;  %v3182_v10 = vld [vmem:[%s4772_s1 + $0x44] sm:$0xf0]  ;;  %s2383_s19 = sshll.u32 %s2378_s25, 4  ;;  %vm1224_vm0 = vcmask 130048  }
   0xe   : > { %3295 = vmatpush.bf16.msra.mxu1 %v2670_v3  ;;  %3296 = vmatpush.bf16.msra.mxu2 %v2670_v3  ;;  %v2646_v11 = vor.u32 %v3182_v10, %v2645_v9  ;;  %p273_p3 = scmp.lt.s32.totalorder %s2383_s19, 31  ;;  %v2637_v12 = vld [vmem:[%s4772_s1 + $0x30] sm:$0xf]  ;;  %v3180_v13 = vld [vmem:[%s4772_s1 + $0x34] sm:$0xf0] }
   0xf   : > { %3297 = vmatpush.bf16.msra.mxu3 %v2670_v3  ;;  %1249 = vmatpush.bf16.msra.mxu0 %v2670_v3  ;;  %v2638_v14 = vor.u32 %v3180_v13, %v2637_v12  ;;  %v2629_v15 = vld [vmem:[%s4772_s1 + $0x20] sm:$0xf]  ;;  %v3178_v16 = vld [vmem:[%s4772_s1 + $0x24] sm:$0xf0]  ;;  %v2621_v18 = vld [vmem:[%s4772_s1 + $0x10] sm:$0xf] }
  0x10   : > { %s4822_s19 = smov (!%p273_p3, %s2383_s19), 31  ;;  %v2630_v17 = vor.u32 %v3178_v16, %v2629_v15  ;;  %v3176_v19 = vld [vmem:[%s4772_s1 + $0x14] sm:$0xf0]  ;;  %v2613_v21 = vld [vmem:[%s4772_s1] sm:$0xf] }
  0x11   : > { %s3319_s29 = smul.u32 28, %s4822_s19  ;;  %v2622_v20 = vor.u32 %v3176_v19, %v2621_v18  ;;  %v3174_v22 = vld [vmem:[%s4772_s1 + $0x4] sm:$0xf0]  ;;  %v2733_v23 = vld [vmem:[%s4772_s1 + $0xf0] sm:$0xf] }
  0x12   : > { %3298 = vmatpush.bf16.msra.mxu1 %v2662_v5  ;;  %3299 = vmatpush.bf16.msra.mxu2 %v2662_v5  ;;  %v3204_v24 = vld [vmem:[%s4772_s1 + $0xf4] sm:$0xf0]  ;;  %v2797_v25 = vld [vmem:[%s4772_s1 + $0x170] sm:$0xf]  ;;  %v2614_v30 = vor.u32 %v3174_v22, %v2613_v21  ;;  %v2725_v34 = vld [vmem:[%s4772_s1 + $0xe0] sm:$0xf] }
  0x13   : > { %3300 = vmatpush.bf16.msra.mxu3 %v2662_v5  ;;  %1250 = vmatpush.bf16.msra.mxu0 %v2662_v5  ;;  %s3434_s13 = scalar_lea.vmem %s4771_s0, %s3319_s29  ;;  %v3220_v26 = vld [vmem:[%s4772_s1 + $0x174] sm:$0xf0]  ;;  %v2861_v28 = vld [vmem:[%s4772_s1 + $0x1f0] sm:$0xf]  ;;  %v2734_v35 = vor.u32 %v3204_v24, %v2733_v23  ;;  %v3202_v38 = vld [vmem:[%s4772_s1 + $0xe4] sm:$0xf0] }
  0x14   : > { %v2445_v27 = vld [vmem:[%s3434_s13 + $0x70] sm:$0xf]  ;;  %v3236_v29 = vld [vmem:[%s4772_s1 + $0x1f4] sm:$0xf0]  ;;  %v3134_v31 = vld [vmem:[%s3434_s13 + $0x88] sm:$0xf0]  ;;  %v2798_v39 = vor.u32 %v3220_v26, %v2797_v25  ;;  %v2726_v52 = vor.u32 %v3202_v38, %v2725_v34 }
  0x15   : > { %v2501_v32 = vld [vmem:[%s3434_s13 + $0xe0] sm:$0xf]  ;;  %v3148_v33 = vld [vmem:[%s3434_s13 + $0xf8] sm:$0xf0]  ;;  %v2557_v36 = vld [vmem:[%s3434_s13 + $0x150] sm:$0xf]  ;;  %v2862_v40 = vor.u32 %v3236_v29, %v2861_v28  ;;  %v3481_v44 = vor.u32 %v3134_v31, %v2445_v27 }
  0x16   : > { %3301 = vmatpush.bf16.msra.mxu1 %v2654_v8  ;;  %3302 = vmatpush.bf16.msra.mxu2 %v2654_v8  ;;  %v3162_v37 = vld [vmem:[%s3434_s13 + $0x168] sm:$0xf0]  ;;  %v2789_v41 = vld [vmem:[%s4772_s1 + $0x160] sm:$0xf]  ;;  %v2925_v42 = vld [vmem:[%s4772_s1 + $0x270] sm:$0xf]  ;;  %v3483_v45 = vor.u32 %v3148_v33, %v2501_v32 }
  0x17   : > { %3303 = vmatpush.bf16.msra.mxu3 %v2654_v8  ;;  %1251 = vmatpush.bf16.msra.mxu0 %v2654_v8  ;;  %v3252_v43 = vld [vmem:[%s4772_s1 + $0x274] sm:$0xf0]  ;;  %v3218_v46 = vld [vmem:[%s4772_s1 + $0x164] sm:$0xf0]  ;;  %v2853_v47 = vld [vmem:[%s4772_s1 + $0x1e0] sm:$0xf]  ;;  %v3494_v49 = vor.u32 %v3162_v37, %v2557_v36 }
  0x18   : > { %v3234_v48 = vld [vmem:[%s4772_s1 + $0x1e4] sm:$0xf0]  ;;  %v2389_v50 = vld [vmem:[%s3434_s13] sm:$0xf]  ;;  %v3120_v51 = vld [vmem:[%s3434_s13 + $0x18] sm:$0xf0]  ;;  %v2926_v55 = vor.u32 %v3252_v43, %v2925_v42  ;;  %v2790_v56 = vor.u32 %v3218_v46, %v2789_v41 }
  0x19   : > { %v2717_v53 = vld [vmem:[%s4772_s1 + $0xd0] sm:$0xf]  ;;  %v3200_v54 = vld [vmem:[%s4772_s1 + $0xd4] sm:$0xf0]  ;;  %v2854_v57 = vor.u32 %v3234_v48, %v2853_v47  ;;  %v2917_v59 = vld [vmem:[%s4772_s1 + $0x260] sm:$0xf]  ;;  %v3518_v62 = vor.u32 %v3120_v51, %v2389_v50 }
  0x1a   : > { %3304 = vmatpush.bf16.msra.mxu1 %v2646_v11  ;;  %3305 = vmatpush.bf16.msra.mxu2 %v2646_v11  ;;  %v2781_v58 = vld [vmem:[%s4772_s1 + $0x150] sm:$0xf]  ;;  %v3250_v60 = vld [vmem:[%s4772_s1 + $0x264] sm:$0xf0]  ;;  %v3216_v61 = vld [vmem:[%s4772_s1 + $0x154] sm:$0xf0]  ;;  %v2718_v2 = vor.u32 %v3200_v54, %v2717_v53 }
  0x1b   : > { %3306 = vmatpush.bf16.msra.mxu3 %v2646_v11  ;;  %1252 = vmatpush.bf16.msra.mxu0 %v2646_v11  ;;  %v2845_v63 = vld [vmem:[%s4772_s1 + $0x1d0] sm:$0xf]  ;;  %v3232_v0 = vld [vmem:[%s4772_s1 + $0x1d4] sm:$0xf0]  ;;  %v2709_v1 = vld [vmem:[%s4772_s1 + $0xc0] sm:$0xf]  ;;  %v2918_v5 = vor.u32 %v3250_v60, %v2917_v59  ;;  %v2782_v6 = vor.u32 %v3216_v61, %v2781_v58 }
  0x1c   : > { %v3198_v3 = vld [vmem:[%s4772_s1 + $0xc4] sm:$0xf0]  ;;  %v2773_v4 = vld [vmem:[%s4772_s1 + $0x140] sm:$0xf]  ;;  %v2846_v7 = vor.u32 %v3232_v0, %v2845_v63  ;;  %v2909_v8 = vld [vmem:[%s4772_s1 + $0x250] sm:$0xf] }
  0x1d   : > { %v3248_v9 = vld [vmem:[%s4772_s1 + $0x254] sm:$0xf0]  ;;  %v3214_v10 = vld [vmem:[%s4772_s1 + $0x144] sm:$0xf0]  ;;  %v2837_v11 = vld [vmem:[%s4772_s1 + $0x1c0] sm:$0xf]  ;;  %v2710_v13 = vor.u32 %v3198_v3, %v2709_v1 }
  0x1e   : > { %3307 = vmatpush.bf16.msra.mxu1 %v2638_v14  ;;  %3308 = vmatpush.bf16.msra.mxu2 %v2638_v14  ;;  %v3230_v12 = vld [vmem:[%s4772_s1 + $0x1c4] sm:$0xf0]  ;;  %v3196_v15 = vld [vmem:[%s4772_s1 + $0xb4] sm:$0xf0]  ;;  %v2910_v16 = vor.u32 %v3248_v9, %v2909_v8  ;;  %v2765_v21 = vld [vmem:[%s4772_s1 + $0x130] sm:$0xf] }
  0x1f   : > { %3309 = vmatpush.bf16.msra.mxu3 %v2638_v14  ;;  %1253 = vmatpush.bf16.msra.mxu0 %v2638_v14  ;;  %v2701_v14 = vld [vmem:[%s4772_s1 + $0xb0] sm:$0xf]  ;;  %v2838_v18 = vor.u32 %v3230_v12, %v2837_v11  ;;  %v2473_v19 = vld [vmem:[%s3434_s13 + $0xa8] sm:$0xf]  ;;  %v2901_v22 = vld [vmem:[%s4772_s1 + $0x240] sm:$0xf] }
  0x20   : > { %v3246_v23 = vld [vmem:[%s4772_s1 + $0x244] sm:$0xf0]  ;;  %v3212_v24 = vld [vmem:[%s4772_s1 + $0x134] sm:$0xf0]  ;;  %v2829_v25 = vld [vmem:[%s4772_s1 + $0x1b0] sm:$0xf] }
  0x21   : > { %v3228_v26 = vld [vmem:[%s4772_s1 + $0x1b4] sm:$0xf0]  ;;  %v3155_v28 = vld [vmem:[%s3434_s13 + $0x130] sm:$0xf0]  ;;  %v2585_v29 = vld [vmem:[%s3434_s13 + $0x188] sm:$0xf]  ;;  %v2902_v34 = vor.u32 %v3246_v23, %v2901_v22 }
  0x22   : > { %3310 = vmatpush.bf16.msra.mxu1 %v2630_v17  ;;  %3311 = vmatpush.bf16.msra.mxu2 %v2630_v17  ;;  %v2529_v27 = vld [vmem:[%s3434_s13 + $0x118] sm:$0xf]  ;;  %v3169_v31 = vld [vmem:[%s3434_s13 + $0x1a0] sm:$0xf0]  ;;  %v2693_v32 = vld [vmem:[%s4772_s1 + $0xa0] sm:$0xf]  ;;  %v2830_v36 = vor.u32 %v3228_v26, %v2829_v25 }
  0x23   : > { %3312 = vmatpush.bf16.msra.mxu3 %v2630_v17  ;;  %1254 = vmatpush.bf16.msra.mxu0 %v2630_v17  ;;  %v2774_v17 = vor.u32 %v3214_v10, %v2773_v4  ;;  %v3194_v33 = vld [vmem:[%s4772_s1 + $0xa4] sm:$0xf0]  ;;  %v2757_v37 = vld [vmem:[%s4772_s1 + $0x120] sm:$0xf]  ;;  %v2893_v38 = vld [vmem:[%s4772_s1 + $0x230] sm:$0xf]  ;;  %v3599_v41 = vor.u32 %v3155_v28, %v2529_v27  ;;  %v3610_v47 = vor.u32 %v3169_v31, %v2585_v29 }
  0x24   : > { %v3210_v42 = vld [vmem:[%s4772_s1 + $0x124] sm:$0xf0]  ;;  %v2821_v43 = vld [vmem:[%s4772_s1 + $0x1a0] sm:$0xf]  ;;  %v2417_v48 = vld [vmem:[%s3434_s13 + $0x38] sm:$0xf]  ;;  %v2694_v51 = vor.u32 %v3194_v33, %v2693_v32 }
  0x25   : > { %v3226_v46 = vld [vmem:[%s4772_s1 + $0x1a4] sm:$0xf0]  ;;  %v3127_v50 = vld [vmem:[%s3434_s13 + $0x50] sm:$0xf0]  ;;  %v3192_v53 = vld [vmem:[%s4772_s1 + $0x94] sm:$0xf0] }
  0x26   : > { %3313 = vmatpush.bf16.msra.mxu1 %v2622_v20  ;;  %3314 = vmatpush.bf16.msra.mxu2 %v2622_v20  ;;  %v2885_v58 = vld [vmem:[%s4772_s1 + $0x220] sm:$0xf]  ;;  %v3242_v59 = vld [vmem:[%s4772_s1 + $0x224] sm:$0xf0]  ;;  %v3208_v60 = vld [vmem:[%s4772_s1 + $0x114] sm:$0xf0]  ;;  %v3634_v61 = vor.u32 %v3127_v50, %v2417_v48 }
  0x27   : > { %3315 = vmatpush.bf16.msra.mxu3 %v2622_v20  ;;  %1255 = vmatpush.bf16.msra.mxu0 %v2622_v20  ;;  %v3141_v20 = vld [vmem:[%s3434_s13 + $0xc0] sm:$0xf0]  ;;  %v2813_v63 = vld [vmem:[%s4772_s1 + $0x190] sm:$0xf]  ;;  %v3224_v0 = vld [vmem:[%s4772_s1 + $0x194] sm:$0xf0]  ;;  %v2886_v4 = vor.u32 %v3242_v59, %v2885_v58 }
  0x28   : > { %v3190_v3 = vld [vmem:[%s4772_s1 + $0x84] sm:$0xf0]  ;;  %v2877_v8 = vld [vmem:[%s4772_s1 + $0x210] sm:$0xf]  ;;  %v3240_v9 = vld [vmem:[%s4772_s1 + $0x214] sm:$0xf0] }
  0x29   : > { %v3206_v10 = vld [vmem:[%s4772_s1 + $0x104] sm:$0xf0]  ;;  %v2805_v11 = vld [vmem:[%s4772_s1 + $0x180] sm:$0xf]  ;;  %v3121_v25 = vld [vmem:[%s3434_s13 + $0x20] sm:$0xf0] }
  0x2a   : > { %3316 = vmatpush.bf16.msra.mxu1 %v2614_v30  ;;  %3317 = vmatpush.bf16.msra.mxu2 %v2614_v30  ;;  %v3222_v12 = vld [vmem:[%s4772_s1 + $0x184] sm:$0xf0]  ;;  %v2391_v22 = vld [vmem:[%s3434_s13 + $0x1c] sm:$0xf0]  ;;  %v3118_v26 = vld [vmem:[%s3434_s13 + $0xc] sm:$0xf] }
  0x2b   : > { %3318 = vmatpush.bf16.msra.mxu3 %v2614_v30  ;;  %1256 = vmatpush.bf16.msra.mxu0 %v2614_v30  ;;  %v2702_v30 = vor.u32 %v3196_v15, %v2701_v14  ;;  %v3268_v14 = vld [vmem:[%s4772_s1 + $0x2f4] sm:$0xf0]  ;;  %v2399_v27 = vld [vmem:[%s3434_s13 + $0x24] sm:$0xf0]  ;;  %v2981_v29 = vld [vmem:[%s4772_s1 + $0x2e0] sm:$0xf] }
  0x2c   : > { %v3696_v33 = vor.u32 %v3118_v26, %v2399_v27  ;;  %v2425_v48 = vld [vmem:[%s3434_s13 + $0x40] sm:$0xf]  ;;  %v3128_v50 = vld [vmem:[%s3434_s13 + $0x58] sm:$0xf0]  ;;  %s2386_s29 = sshll.u32 %s4822_s19, 3 }
  0x2d   : > { %1267 = vmatmul.bf16.vlgmr.msra.gmra.mxu1 %v3481_v44  ;;  %1277 = vmatmul.bf16.vlgmr.msra.gmra.mxu2 %v3483_v45  ;;  %v2965_v59 = vld [vmem:[%s4772_s1 + $0x2c0] sm:$0xf]  ;;  %s4750_s11 = scalar_lea.vmem %s4778_s7, %s2386_s29 }
  0x2e   : > { %1298 = vmatpush.bf16.msrb.mxu1 %v2734_v35  ;;  %1347 = vmatpush.bf16.msrb.mxu2 %v2798_v39  ;;  %v2766_v35 = vor.u32 %v3212_v24, %v2765_v21  ;;  %v3244_v39 = vld [vmem:[%s4772_s1 + $0x234] sm:$0xf0]  ;;  %v3117_v21 = vld [vmem:[%s3434_s13 + $0x4] sm:$0xf]  ;;  %v2397_v24 = vld [vmem:[%s3434_s13 + $0x8] sm:$0xf] }
  0x2f   : > { %1396 = vmatpush.bf16.msrb.mxu3 %v2862_v40  ;;  %1445 = vmatpush.bf16.msrb.mxu0 %v2926_v55  ;;  %v3597_v40 = vor.u32 %v3141_v20, %v2473_v19  ;;  %v2894_v54 = vor.u32 %v3244_v39, %v2893_v38  ;;  %v2758_v55 = vor.u32 %v3210_v42, %v2757_v37  ;;  %v2869_v19 = vld [vmem:[%s4772_s1 + $0x200] sm:$0xf]  ;;  %v3238_v20 = vld [vmem:[%s4772_s1 + $0x204] sm:$0xf0]  ;;  %v2973_v38 = vld [vmem:[%s4772_s1 + $0x2d0] sm:$0xf] }
  0x30   : > { %1287 = vmatmul.bf16.vlgmr.msra.gmra.mxu3 %v3494_v49  ;;  %1257 = vmatmul.bf16.vlgmr.msra.gmra.mxu0 %v3518_v62  ;;  %v2870_v28 = vor.u32 %v3238_v20, %v2869_v19  ;;  %v3692_v31 = vor.u32 %v3117_v21, %v2391_v22  ;;  %v3694_v32 = vor.u32 %v3121_v25, %v2397_v24  ;;  %v3264_v39 = vld [vmem:[%s4772_s1 + $0x2d4] sm:$0xf0]  ;;  %v3139_v19 = vld [vmem:[%s3434_s13 + $0xb4] sm:$0xf]  ;;  %v2483_v20 = vld [vmem:[%s3434_s13 + $0xcc] sm:$0xf0] }
  0x31   : > { %v2974_v42 = vor.u32 %v3264_v39, %v2973_v38  ;;  %v2489_v24 = vld [vmem:[%s3434_s13 + $0xb8] sm:$0xf]  ;;  %v3143_v25 = vld [vmem:[%s3434_s13 + $0xd0] sm:$0xf0]  ;;  %v2949_v27 = vld [vmem:[%s4772_s1 + $0x2a0] sm:$0xf] }
  0x32   : > { %1299 = vmatpush.bf16.msrb.mxu1 %v2726_v52  ;;  %1348 = vmatpush.bf16.msrb.mxu2 %v2790_v56  ;;  %v2685_v52 = vld [vmem:[%s4772_s1 + $0x90] sm:$0xf]  ;;  %v2822_v56 = vor.u32 %v3226_v46, %v2821_v43  ;;  %v3124_v43 = vld [vmem:[%s3434_s13 + $0x3c] sm:$0xf]  ;;  %v2419_v46 = vld [vmem:[%s3434_s13 + $0x54] sm:$0xf0]  ;;  %v3780_v26 = vor.u32 %v3143_v25, %v2489_v24 }
  0x33   : > { %1397 = vmatpush.bf16.msrb.mxu3 %v2854_v57  ;;  %1446 = vmatpush.bf16.msrb.mxu0 %v2918_v5  ;;  %v2749_v57 = vld [vmem:[%s4772_s1 + $0x110] sm:$0xf]  ;;  %v2686_v1 = vor.u32 %v3192_v53, %v2685_v52  ;;  %v2427_v52 = vld [vmem:[%s3434_s13 + $0x5c] sm:$0xf0]  ;;  %v3718_v53 = vor.u32 %v3124_v43, %v2419_v46  ;;  %v3146_v38 = vld [vmem:[%s3434_s13 + $0xec] sm:$0xf] }
  0x34   : > { %v2750_v5 = vor.u32 %v3208_v60, %v2749_v57  ;;  %v3129_v57 = vld [vmem:[%s3434_s13 + $0x60] sm:$0xf0]  ;;  %v3262_v60 = vld [vmem:[%s4772_s1 + $0x2c4] sm:$0xf0]  ;;  %v2647_v25 = vld [vmem:[%s4772_s1 + $0x48] sm:$0xf0] }
  0x35   : > { %v2511_v39 = vld [vmem:[%s3434_s13 + $0x104] sm:$0xf0]  ;;  %v3181_v24 = vld [vmem:[%s4772_s1 + $0x44] sm:$0xf] }
  0x36   : > { %1300 = vmatpush.bf16.msrb.mxu1 %v2718_v2  ;;  %1349 = vmatpush.bf16.msrb.mxu2 %v2782_v6  ;;  %v2677_v2 = vld [vmem:[%s4772_s1 + $0x80] sm:$0xf]  ;;  %v2814_v6 = vor.u32 %v3224_v0, %v2813_v63  ;;  %v2966_v63 = vor.u32 %v3262_v60, %v2965_v59  ;;  %v3131_v0 = vld [vmem:[%s3434_s13 + $0x74] sm:$0xf]  ;;  %v3800_v46 = vor.u32 %v3146_v38, %v2511_v39  ;;  %v2671_v60 = vld [vmem:[%s4772_s1 + $0x78] sm:$0xf0] }
  0x37   : > { %1398 = vmatpush.bf16.msrb.mxu3 %v2846_v7  ;;  %1447 = vmatpush.bf16.msrb.mxu0 %v2910_v16  ;;  %v2741_v7 = vld [vmem:[%s4772_s1 + $0x100] sm:$0xf]  ;;  %v2678_v15 = vor.u32 %v3190_v3, %v2677_v2  ;;  %v2878_v16 = vor.u32 %v3240_v9, %v2877_v8  ;;  %v2453_v2 = vld [vmem:[%s3434_s13 + $0x78] sm:$0xf]  ;;  %v3135_v3 = vld [vmem:[%s3434_s13 + $0x90] sm:$0xf0] }
  0x38   : > { %v2461_v9 = vld [vmem:[%s3434_s13 + $0x80] sm:$0xf]  ;;  %4794 = vst [vmem:[#allocation3_spill] sm:$0xff] %v3800_v46 }
  0x39   : > { %v2933_v39 = vld [vmem:[%s4772_s1 + $0x280] sm:$0xf] }
  0x3a   : > { %1301 = vmatpush.bf16.msrb.mxu1 %v2710_v13  ;;  %1350 = vmatpush.bf16.msrb.mxu2 %v2774_v17  ;;  %v2989_v13 = vld [vmem:[%s4772_s1 + $0x2f0] sm:$0xf]  ;;  %v2742_v17 = vor.u32 %v3206_v10, %v2741_v7  ;;  %v3746_v7 = vor.u32 %v3135_v3, %v2453_v2  ;;  %v3136_v10 = vld [vmem:[%s3434_s13 + $0x98] sm:$0xf0] }
  0x3b   : > { %1399 = vmatpush.bf16.msrb.mxu3 %v2838_v18  ;;  %1448 = vmatpush.bf16.msrb.mxu0 %v2902_v34  ;;  %v2806_v18 = vor.u32 %v3222_v12, %v2805_v11  ;;  %v2990_v23 = vor.u32 %v3268_v14, %v2989_v13  ;;  %v2405_v34 = vld [vmem:[%s3434_s13 + $0x10] sm:$0xf]  ;;  %v3754_v11 = vor.u32 %v3136_v10, %v2461_v9  ;;  %v3260_v13 = vld [vmem:[%s4772_s1 + $0x2b4] sm:$0xf0]  ;;  %v3152_v3 = vld [vmem:[%s3434_s13 + $0x11c] sm:$0xf] }
  0x3c   : > { %v2957_v12 = vld [vmem:[%s4772_s1 + $0x2b0] sm:$0xf]  ;;  %v2655_v9 = vld [vmem:[%s4772_s1 + $0x58] sm:$0xf0]  ;;  %v3203_v10 = vld [vmem:[%s4772_s1 + $0xf4] sm:$0xf] }
  0x3d   : > { %1272 = vmatmul.bf16.gmra.mxu1 %v3597_v40  ;;  %1282 = vmatmul.bf16.gmra.mxu2 %v3599_v41  ;;  %v2958_v14 = vor.u32 %v3260_v13, %v2957_v12  ;;  %v2537_v12 = vld [vmem:[%s3434_s13 + $0x120] sm:$0xf]  ;;  %v3156_v13 = vld [vmem:[%s3434_s13 + $0x138] sm:$0xf0] }
  0x3e   : > { %1302 = vmatpush.bf16.msrb.mxu1 %v2702_v30  ;;  %1351 = vmatpush.bf16.msrb.mxu2 %v2766_v35  ;;  %v3266_v30 = vld [vmem:[%s4772_s1 + $0x2e4] sm:$0xf0]  ;;  %v3122_v35 = vld [vmem:[%s3434_s13 + $0x28] sm:$0xf0] }
  0x3f   : > { %1400 = vmatpush.bf16.msrb.mxu3 %v2830_v36  ;;  %1449 = vmatpush.bf16.msrb.mxu0 %v2894_v54  ;;  %v2982_v36 = vor.u32 %v3266_v30, %v2981_v29  ;;  %v3702_v37 = vor.u32 %v3122_v35, %v2405_v34  ;;  %v3720_v54 = vor.u32 %v3128_v50, %v2425_v48  ;;  %v3145_v30 = vld [vmem:[%s3434_s13 + $0xe4] sm:$0xf]  ;;  %v2503_v34 = vld [vmem:[%s3434_s13 + $0xfc] sm:$0xf0]  ;;  %v2509_v35 = vld [vmem:[%s3434_s13 + $0xe8] sm:$0xf] }
  0x40   : > { %1292 = vmatmul.bf16.gmra.mxu3 %v3610_v47  ;;  %1262 = vmatmul.bf16.gmra.mxu0 %v3634_v61  ;;  %v2517_v48 = vld [vmem:[%s3434_s13 + $0xf0] sm:$0xf]  ;;  %v3150_v50 = vld [vmem:[%s3434_s13 + $0x108] sm:$0xf0] }
  0x42   : > { %1303 = vmatpush.bf16.msrb.mxu1 %v2694_v51  ;;  %1352 = vmatpush.bf16.msrb.mxu2 %v2758_v55  ;;  %v3125_v51 = vld [vmem:[%s3434_s13 + $0x44] sm:$0xf] }
  0x43   : > { %1401 = vmatpush.bf16.msrb.mxu3 %v2822_v56  ;;  %1450 = vmatpush.bf16.msrb.mxu0 %v2886_v4  ;;  %v3722_v55 = vor.u32 %v3125_v51, %v2427_v52  ;;  %v2433_v56 = vld [vmem:[%s3434_s13 + $0x48] sm:$0xf]  ;;  %v3132_v4 = vld [vmem:[%s3434_s13 + $0x7c] sm:$0xf]  ;;  %v3806_v51 = vor.u32 %v3150_v50, %v2517_v48  ;;  %v2941_v52 = vld [vmem:[%s4772_s1 + $0x290] sm:$0xf] }
  0x44   : > { %v3728_v58 = vor.u32 %v3129_v57, %v2433_v56  ;;  %v3256_v56 = vld [vmem:[%s4772_s1 + $0x294] sm:$0xf0]  ;;  %v3187_v57 = vld [vmem:[%s4772_s1 + $0x74] sm:$0xf]  ;;  %v3254_v48 = vld [vmem:[%s4772_s1 + $0x284] sm:$0xf0] }
  0x45   : > { %4795 = vst [vmem:[#allocation4_spill] sm:$0xff] %v3806_v51  ;;  %v2942_v59 = vor.u32 %v3256_v56, %v2941_v52  ;;  %v3179_v50 = vld [vmem:[%s4772_s1 + $0x34] sm:$0xf]  ;;  %v2934_v52 = vor.u32 %v3254_v48, %v2933_v39  ;;  %v2639_v56 = vld [vmem:[%s4772_s1 + $0x38] sm:$0xf0] }
  0x46   : > { %1304 = vmatpush.bf16.msrb.mxu1 %v2686_v1  ;;  %1353 = vmatpush.bf16.msrb.mxu2 %v2750_v5  ;;  %v2447_v1 = vld [vmem:[%s3434_s13 + $0x8c] sm:$0xf0]  ;;  %v2455_v5 = vld [vmem:[%s3434_s13 + $0x94] sm:$0xf0]  ;;  %v3173_v39 = vld [vmem:[%s4772_s1 + $0x4] sm:$0xf] }
  0x47   : > { %1402 = vmatpush.bf16.msrb.mxu3 %v2814_v6  ;;  %1451 = vmatpush.bf16.msrb.mxu0 %v2878_v16  ;;  %v3744_v6 = vor.u32 %v3131_v0, %v2447_v1  ;;  %v3748_v8 = vor.u32 %v3132_v4, %v2455_v5  ;;  %v2475_v16 = vld [vmem:[%s3434_s13 + $0xc4] sm:$0xf0]  ;;  %v3185_v0 = vld [vmem:[%s4772_s1 + $0x64] sm:$0xf]  ;;  %v2663_v1 = vld [vmem:[%s4772_s1 + $0x68] sm:$0xf0] }
  0x48   : > { %v2666_v2 = vor.u32 %v3185_v0, %v2663_v1  ;;  %v2531_v4 = vld [vmem:[%s3434_s13 + $0x134] sm:$0xf0]  ;;  %v3183_v5 = vld [vmem:[%s4772_s1 + $0x54] sm:$0xf]  ;;  %v2997_v0 = vld [vmem:[%s4772_s1 + $0x300] sm:$0xf] }
  0x49   : > { %v3270_v1 = vld [vmem:[%s4772_s1 + $0x304] sm:$0xf0]  ;;  %v2615_v48 = vld [vmem:[%s4772_s1 + $0x8] sm:$0xf0] }
  0x4a   : > { %1305 = vmatpush.bf16.msrb.mxu1 %v2678_v15  ;;  %1354 = vmatpush.bf16.msrb.mxu2 %v2742_v17  ;;  %v3138_v15 = vld [vmem:[%s3434_s13 + $0xac] sm:$0xf]  ;;  %v2481_v17 = vld [vmem:[%s3434_s13 + $0xb0] sm:$0xf] }
  0x4b   : > { %1403 = vmatpush.bf16.msrb.mxu3 %v2806_v18  ;;  %1452 = vmatpush.bf16.msrb.mxu0 %v2870_v28  ;;  %v3142_v18 = vld [vmem:[%s3434_s13 + $0xc8] sm:$0xf0]  ;;  %v3770_v21 = vor.u32 %v3138_v15, %v2475_v16  ;;  %v3258_v28 = vld [vmem:[%s4772_s1 + $0x2a4] sm:$0xf0]  ;;  %v2735_v15 = vld [vmem:[%s4772_s1 + $0xf8] sm:$0xf0] }
  0x4c   : > { %v3772_v22 = vor.u32 %v3142_v18, %v2481_v17  ;;  %v2950_v29 = vor.u32 %v3258_v28, %v2949_v27  ;;  %v3153_v16 = vld [vmem:[%s3434_s13 + $0x124] sm:$0xf]  ;;  %v2539_v17 = vld [vmem:[%s3434_s13 + $0x13c] sm:$0xf0]  ;;  %v2738_v18 = vor.u32 %v3203_v10, %v2735_v15  ;;  %v3175_v15 = vld [vmem:[%s4772_s1 + $0x14] sm:$0xf] }
  0x4d   : > { %1306 = vmatmul.bf16.vlgmr.msrb.gmra.mxu1 %v3692_v31  ;;  %1355 = vmatmul.bf16.vlgmr.msrb.gmra.mxu2 %v3694_v32  ;;  %v3201_v27 = vld [vmem:[%s4772_s1 + $0xe4] sm:$0xf]  ;;  %v3859_v28 = vor.u32 %v3153_v16, %v2539_v17  ;;  %v2623_v16 = vld [vmem:[%s4772_s1 + $0x18] sm:$0xf0]  ;;  %v3195_v17 = vld [vmem:[%s4772_s1 + $0xb4] sm:$0xf] }
  0x4e   : > { %1494 = vmatpush.bf16.msra.mxu1 %v2990_v23  ;;  %v3774_v23 = vor.u32 %v3139_v19, %v2483_v20  ;;  %v3846_v19 = vor.u32 %v3152_v3, %v2531_v4  ;;  %v3848_v20 = vor.u32 %v3156_v13, %v2537_v12  ;;  %v2998_v3 = vor.u32 %v3270_v1, %v2997_v0  ;;  %v2631_v4 = vld [vmem:[%s4772_s1 + $0x28] sm:$0xf0]  ;;  %v3159_v13 = vld [vmem:[%s3434_s13 + $0x154] sm:$0xf]  ;;  %v3951_v1 = vld [vmem:[%s4773_s2] sm:$0x3] }
  0x4f   : > { %1641 = vmatpush.bf16.msra.mxu0 %v2738_v18  ;;  %4797 = vst [vmem:[#allocation6_spill] sm:$0xff] %v3859_v28  ;;  %v2565_v18 = vld [vmem:[%s3434_s13 + $0x158] sm:$0xf] }
  0x50   : > { %1404 = vmatmul.bf16.vlgmr.msrb.gmra.mxu3 %v3696_v33  ;;  %1453 = vmatmul.bf16.vlgmr.msrb.gmra.mxu0 %v3702_v37  ;;  %4796 = vst [vmem:[#allocation5_spill] sm:$0xff] %v3848_v20 }
  0x51   : > { %1550 = vmatpush.bf16.msra.mxu2 %v2998_v3  ;;  %v3219_v3 = vld [vmem:[%s4772_s1 + $0x174] sm:$0xf] }
  0x52   : > { %1495 = vmatpush.bf16.msra.mxu1 %v2982_v36  ;;  %v3149_v36 = vld [vmem:[%s3434_s13 + $0x100] sm:$0xf0] }
  0x53   : > { %v3798_v43 = vor.u32 %v3149_v36, %v2509_v35  ;;  %v2650_v35 = vor.u32 %v3181_v24, %v2647_v25  ;;  %v3163_v24 = vld [vmem:[%s3434_s13 + $0x170] sm:$0xf0]  ;;  %v2703_v25 = vld [vmem:[%s4772_s1 + $0xb8] sm:$0xf0] }
  0x55   : > { %4793 = vst [vmem:[#allocation2_spill] sm:$0xff] %v3798_v43 }
  0x56   : > { %1496 = vmatpush.bf16.msra.mxu1 %v2974_v42  ;;  %v3796_v42 = vor.u32 %v3145_v30, %v2503_v34  ;;  %v3157_v30 = vld [vmem:[%s3434_s13 + $0x140] sm:$0xf0]  ;;  %v2727_v34 = vld [vmem:[%s4772_s1 + $0xe8] sm:$0xf0] }
  0x57   : > { %v2730_v36 = vor.u32 %v3201_v27, %v2727_v34  ;;  %v3160_v27 = vld [vmem:[%s3434_s13 + $0x15c] sm:$0xf]  ;;  %v2706_v34 = vor.u32 %v3195_v17, %v2703_v25 }
  0x59   : > { %1642 = vmatpush.bf16.msra.mxu0 %v2730_v36  ;;  %v3928_v36 = vor.u32 %v3163_v24, %v2565_v18  ;;  %v3189_v18 = vld [vmem:[%s4772_s1 + $0x84] sm:$0xf]  ;;  %v2679_v24 = vld [vmem:[%s4772_s1 + $0x88] sm:$0xf0] }
  0x5a   : > { %1497 = vmatpush.bf16.msra.mxu1 %v2966_v63  ;;  %v2674_v63 = vor.u32 %v3187_v57, %v2671_v60  ;;  %v3199_v57 = vld [vmem:[%s4772_s1 + $0xd4] sm:$0xf]  ;;  %v2642_v60 = vor.u32 %v3179_v50, %v2639_v56  ;;  %v3193_v50 = vld [vmem:[%s4772_s1 + $0xa4] sm:$0xf] }
  0x5b   : > { %4799 = vst [vmem:[#allocation8_spill] sm:$0xff] %v3928_v36 }
  0x5c   : > { %1592 = vmatpush.bf16.msra.mxu3 %v2674_v63 }
  0x5d   : > { %1311 = vmatmul.bf16.gmra.mxu1 %v3718_v53  ;;  %1360 = vmatmul.bf16.gmra.mxu2 %v3720_v54 }
  0x5e   : > { %1498 = vmatpush.bf16.msra.mxu1 %v2958_v14  ;;  %v2658_v14 = vor.u32 %v3183_v5, %v2655_v9  ;;  %v3197_v5 = vld [vmem:[%s4772_s1 + $0xc4] sm:$0xf]  ;;  %v2711_v9 = vld [vmem:[%s4772_s1 + $0xc8] sm:$0xf0] }
  0x5f   : > { %v2714_v12 = vor.u32 %v3197_v5, %v2711_v9  ;;  %v3191_v5 = vld [vmem:[%s4772_s1 + $0x94] sm:$0xf] }
  0x60   : > { %1409 = vmatmul.bf16.gmra.mxu3 %v3722_v55  ;;  %1458 = vmatmul.bf16.gmra.mxu0 %v3728_v58 }
  0x61   : > { %1593 = vmatpush.bf16.msra.mxu3 %v2666_v2  ;;  %v3177_v2 = vld [vmem:[%s4772_s1 + $0x24] sm:$0xf] }
  0x62   : > { %1499 = vmatpush.bf16.msra.mxu1 %v2950_v29  ;;  %v2545_v29 = vld [vmem:[%s3434_s13 + $0x128] sm:$0xf]  ;;  %v2634_v10 = vor.u32 %v3177_v2, %v2631_v4  ;;  %v2799_v4 = vld [vmem:[%s4772_s1 + $0x178] sm:$0xf0] }
  0x63   : > { %v3868_v38 = vor.u32 %v3157_v30, %v2545_v29  ;;  %v2567_v29 = vld [vmem:[%s3434_s13 + $0x174] sm:$0xf0]  ;;  %v2626_v30 = vor.u32 %v3175_v15, %v2623_v16 }
  0x64   : > { %v3941_v56 = vor.u32 %v3160_v27, %v2567_v29  ;;  %v2682_v29 = vor.u32 %v3189_v18, %v2679_v24  ;;  %v3217_v18 = vld [vmem:[%s4772_s1 + $0x164] sm:$0xf]  ;;  %v2791_v24 = vld [vmem:[%s4772_s1 + $0x168] sm:$0xf0] }
  0x65   : > { %1594 = vmatpush.bf16.msra.mxu3 %v2658_v14  ;;  %4798 = vst [vmem:[#allocation7_spill] sm:$0xff] %v3868_v38  ;;  %v2559_v14 = vld [vmem:[%s3434_s13 + $0x16c] sm:$0xf0] }
  0x66   : > { %1500 = vmatpush.bf16.msra.mxu1 %v2942_v59  ;;  %v2719_v59 = vld [vmem:[%s4772_s1 + $0xd8] sm:$0xf0]  ;;  %4800 = vst [vmem:[#allocation9_spill] sm:$0xff] %v3941_v56 }
  0x67   : > { %v2722_v63 = vor.u32 %v3199_v57, %v2719_v59  ;;  %v2573_v57 = vld [vmem:[%s3434_s13 + $0x160] sm:$0xf]  ;;  %v3164_v59 = vld [vmem:[%s3434_s13 + $0x178] sm:$0xf0] }
  0x68   : > { %v3955_v2 = vor.u32 %v3164_v59, %v2573_v57  ;;  %v3167_v57 = vld [vmem:[%s3434_s13 + $0x194] sm:$0xf]  ;;  %v2595_v59 = vld [vmem:[%s3434_s13 + $0x1ac] sm:$0xf0] }
  0x69   : > { %1595 = vmatpush.bf16.msra.mxu3 %v2650_v35  ;;  %1643 = vmatpush.bf16.msra.mxu0 %v2722_v63  ;;  %v3926_v35 = vor.u32 %v3159_v13, %v2559_v14  ;;  %v2618_v63 = vor.u32 %v3173_v39, %v2615_v48  ;;  %v3971_v13 = vperm.slane %v3951_v1, 0  ;;  %v2587_v39 = vld [vmem:[%s3434_s13 + $0x1a4] sm:$0xf0]  ;;  %v2593_v48 = vld [vmem:[%s3434_s13 + $0x190] sm:$0xf] }
  0x6a   : > { %1501 = vmatpush.bf16.msra.mxu1 %v2934_v52  ;;  %4801 = vst [vmem:[#allocation10_spill] sm:$0xff] %v3955_v2 }
  0x6d   : > { %1316 = vmatmul.bf16.gmra.mxu1 %v3744_v6  ;;  %1365 = vmatmul.bf16.gmra.mxu2 %v3746_v7 }
  0x6e   : > { %1596 = vmatpush.bf16.msra.mxu3 %v2642_v60  ;;  %1644 = vmatpush.bf16.msra.mxu0 %v2714_v12  ;;  %v2695_v60 = vld [vmem:[%s4772_s1 + $0xa8] sm:$0xf0]  ;;  %v2687_v12 = vld [vmem:[%s4772_s1 + $0x98] sm:$0xf0] }
  0x6f   : > { %v2698_v0 = vor.u32 %v3193_v50, %v2695_v60  ;;  %v2690_v14 = vor.u32 %v3191_v5, %v2687_v12  ;;  %v3170_v50 = vld [vmem:[%s3434_s13 + $0x1a8] sm:$0xf0]  ;;  %v4006_v12 = vor.u32 %v3167_v57, %v2595_v59 }
  0x70   : > { %1414 = vmatmul.bf16.gmra.mxu3 %v3748_v8  ;;  %1463 = vmatmul.bf16.gmra.mxu0 %v3754_v11 }
  0x71   : > { %4803 = vst [vmem:[#allocation12_spill] sm:$0xff] %v4006_v12 }
  0x72   : > { %1597 = vmatpush.bf16.msra.mxu3 %v2634_v10  ;;  %1645 = vmatpush.bf16.msra.mxu0 %v2706_v34  ;;  %v2802_v10 = vor.u32 %v3219_v3, %v2799_v4  ;;  %v3999_v4 = vor.u32 %v3170_v50, %v2593_v48 }
  0x74   : > { %1690 = vmatpush.bf16.msrb.mxu1 %v2802_v10  ;;  %4802 = vst [vmem:[#allocation11_spill] sm:$0xff] %v3999_v4 }
  0x76   : > { %1598 = vmatpush.bf16.msra.mxu3 %v2626_v30  ;;  %1646 = vmatpush.bf16.msra.mxu0 %v2698_v0  ;;  %v3166_v30 = vld [vmem:[%s3434_s13 + $0x18c] sm:$0xf] }
  0x77   : > { %v3997_v3 = vor.u32 %v3166_v30, %v2587_v39  ;;  %v2794_v30 = vor.u32 %v3217_v18, %v2791_v24 }
  0x79   : > { %1691 = vmatpush.bf16.msrb.mxu1 %v2794_v30 }
  0x7a   : > { %1599 = vmatpush.bf16.msra.mxu3 %v2618_v63  ;;  %1647 = vmatpush.bf16.msra.mxu0 %v2690_v14  ;;  %v2601_v14 = vld [vmem:[%s3434_s13 + $0x198] sm:$0xf] }
  0x7d   : > { %1321 = vmatmul.bf16.gmra.mxu1 %v3770_v21  ;;  %1370 = vmatmul.bf16.gmra.mxu2 %v3772_v22 }
  0x7e   : > { %1648 = vmatpush.bf16.msra.mxu0 %v2682_v29 }
  0x80   : > { %1419 = vmatmul.bf16.gmra.mxu3 %v3774_v23  ;;  %1468 = vmatmul.bf16.gmra.mxu0 %v3780_v26 }
  0x8d   : > { %1326 = vmatmul.bf16.gmra.mxu1 %v3796_v42  ;;  %1375 = vmatmul.bf16.gmra.mxu2 %v3798_v43 }
  0x90   : > { %1424 = vmatmul.bf16.gmra.mxu3 %v3800_v46  ;;  %1473 = vmatmul.bf16.gmra.mxu0 %v3806_v51  ;;  %v2441_v51 = vld [vmem:[%s3434_s13 + $0x50] sm:$0xf]  ;;  %v3130_v46 = vld [vmem:[%s3434_s13 + $0x68] sm:$0xf0] }
  0x9d   : > { %1331 = vmatmul.bf16.gmra.mxu1 %v3846_v19  ;;  %1380 = vmatmul.bf16.gmra.mxu2 %v3848_v20 }
  0xa0   : > { %1429 = vmatmul.bf16.gmra.mxu3 %v3859_v28  ;;  %1478 = vmatmul.bf16.gmra.mxu0 %v3868_v38  ;;  %v3126_v28 = vld [vmem:[%s3434_s13 + $0x4c] sm:$0xf] }
  0xaa   : > { %v3939_v52 = vpop.f32.mrf.mxu1 }
  0xad   : > { %1336 = vmatmul.bf16.gmra.mxu1 %v3926_v35  ;;  %1385 = vmatmul.bf16.gmra.mxu2 %v3928_v36  ;;  %v1258_v9 = vpop.f32.mrf.mxu0 }
  0xae   : > { %v1259_v18 = vadd.f32 %v1258_v9, %v3971_v13  ;;  %v3215_v9 = vld [vmem:[%s4772_s1 + $0x154] sm:$0xf] }
  0xb0   : > { %1434 = vmatmul.bf16.gmra.mxu3 %v3941_v56  ;;  %v1278_v15 = vpop.f32.mrf.mxu2  ;;  %1483 = vmatmul.bf16.gmra.mxu0 %v3955_v2 }
  0xb1   : > { %v3974_v16 = vadd.f32 %v1278_v15, %v3971_v13  ;;  %v3171_v15 = vld [vmem:[%s3434_s13 + $0x1b0] sm:$0xf0] }
  0xb2   : > { %v3983_v25 = vpop.f32.mrf.mxu1 }
  0xb3   : > { %v1288_v17 = vpop.f32.mrf.mxu3 }
  0xb4   : > { %v3986_v27 = vadd.f32 %v1288_v17, %v3971_v13  ;;  %v4012_v17 = vor.u32 %v3171_v15, %v2601_v14  ;;  %v2407_v14 = vld [vmem:[%s3434_s13 + $0x2c] sm:$0xf0]  ;;  %v2413_v15 = vld [vmem:[%s3434_s13 + $0x18] sm:$0xf] }
  0xb5   : > { %v1260_v34 = vpop.f32.mrf.mxu0 }
  0xb6   : > { %4804 = vst [vmem:[#allocation13_spill] sm:$0xff] %v4012_v17 }
  0xb8   : > { %v1280_v60 = vpop.f32.mrf.mxu2 }
  0xb9   : > { %v3995_v63 = vadd.f32 %v1280_v60, %v3971_v13  ;;  %v3119_v60 = vld [vmem:[%s3434_s13 + $0x14] sm:$0xf] }
  0xba   : > { %v4001_v5 = vpop.f32.mrf.mxu1 }
  0xbb   : > { %v1290_v0 = vpop.f32.mrf.mxu3 }
  0xbc   : > { %v4004_v10 = vadd.f32 %v1290_v0, %v3971_v13 }
  0xbd   : > { %1341 = vmatmul.bf16.gmra.mxu1 %v3997_v3  ;;  %1390 = vmatmul.bf16.gmra.mxu2 %v3999_v4  ;;  %v1263_v29 = vpop.f32.mrf.mxu0  ;;  %v4038_v4 = vor.u32 %v3119_v60, %v2407_v14 }
  0xc0   : > { %1439 = vmatmul.bf16.gmra.mxu3 %v4006_v12  ;;  %v1283_v39 = vpop.f32.mrf.mxu2  ;;  %1488 = vmatmul.bf16.gmra.mxu0 %v4012_v17  ;;  %v3123_v12 = vld [vmem:[%s3434_s13 + $0x30] sm:$0xf0] }
  0xc1   : > { %v4022_v48 = vadd.f32 %v1283_v39, %v3971_v13  ;;  %v4040_v17 = vor.u32 %v3123_v12, %v2413_v15  ;;  %v2783_v12 = vld [vmem:[%s4772_s1 + $0x158] sm:$0xf0]  ;;  %v1261_v15 = vadd.f32 %v1260_v34, %v3971_v13 }
  0xc2   : > { %v4025_v57 = vpop.f32.mrf.mxu1  ;;  %v2786_v14 = vor.u32 %v3215_v9, %v2783_v12  ;;  %v1264_v9 = vadd.f32 %v1263_v29, %v3971_v13 }
  0xc3   : > { %v1293_v50 = vpop.f32.mrf.mxu3  ;;  %4805 = vst [vmem:[#allocation14_spill] sm:$0xff] %v4040_v17 }
  0xc4   : > { %v4028_v59 = vadd.f32 %v1293_v50, %v3971_v13  ;;  %1692 = vmatpush.bf16.msrb.mxu1 %v2786_v14 }
  0xc5   : > { %v1265_v0 = vpop.f32.mrf.mxu0 }
  0xc8   : > { %v1285_v24 = vpop.f32.mrf.mxu2 }
  0xc9   : > { %v4036_v30 = vadd.f32 %v1285_v24, %v3971_v13 }
  0xca   : > { %v1307_v50 = vpop.f32.mrf.mxu1 }
  0xcb   : > { %v1295_v39 = vpop.f32.mrf.mxu3  ;;  %v1308_v56 = vadd.f32 %v1307_v50, %v1259_v18 }
  0xcc   : > { %v4043_v2 = vadd.f32 %v1295_v39, %v3971_v13 }
  0xcd   : > { %1502 = vmatmul.bf16.vlgmr.msra.gmra.mxu1 %v4038_v4  ;;  %3003 = vmatmul.msk.bf16.vlgmr.msra.gmra.mxu2 %vm1224_vm0, %v4040_v17  ;;  %v1454_v60 = vpop.f32.mrf.mxu0 }
  0xd0   : > { %1600 = vmatmul.bf16.vlgmr.msra.gmra.mxu3 %v3518_v62  ;;  %v1356_v18 = vpop.f32.mrf.mxu2  ;;  %1649 = vmatmul.bf16.vlgmr.msra.gmra.mxu0 %v3692_v31  ;;  %v2435_v62 = vld [vmem:[%s3434_s13 + $0x64] sm:$0xf0] }
  0xd1   : > { %v1357_v24 = vadd.f32 %v1356_v18, %v1308_v56  ;;  %v4064_v14 = vor.u32 %v3126_v28, %v2435_v62  ;;  %v4066_v56 = vor.u32 %v3130_v46, %v2441_v51  ;;  %v2775_v46 = vld [vmem:[%s4772_s1 + $0x148] sm:$0xf0] }
  0xd2   : > { %v1309_v50 = vpop.f32.mrf.mxu1 }
  0xd3   : > { %v1405_v39 = vpop.f32.mrf.mxu3  ;;  %v1310_v17 = vadd.f32 %v1309_v50, %v1261_v15 }
  0xd4   : > { %v1406_v36 = vadd.f32 %v1405_v39, %v1357_v24 }
  0xd5   : > { %v1456_v20 = vpop.f32.mrf.mxu0 }
  0xd6   : > { %v4057_v38 = vadd.f32 %v1454_v60, %v1406_v36  ;;  %v3213_v36 = vld [vmem:[%s4772_s1 + $0x144] sm:$0xf] }
  0xd7   : > { %v2778_v51 = vor.u32 %v3213_v36, %v2775_v46 }
  0xd8   : > { %v1358_v12 = vpop.f32.mrf.mxu2 }
  0xd9   : > { %v1359_v34 = vadd.f32 %v1358_v12, %v1310_v17  ;;  %1693 = vmatpush.bf16.msrb.mxu1 %v2778_v51 }
  0xda   : > { %v1312_v31 = vpop.f32.mrf.mxu1 }
  0xdb   : > { %v1407_v43 = vpop.f32.mrf.mxu3  ;;  %v1313_v18 = vadd.f32 %v1312_v31, %v1264_v9  ;;  %v3133_v9 = vld [vmem:[%s3434_s13 + $0x84] sm:$0xf] }
  0xdc   : > { %v1408_v15 = vadd.f32 %v1407_v43, %v1359_v34  ;;  %v2469_v34 = vld [vmem:[%s3434_s13 + $0x88] sm:$0xf]  ;;  %v3137_v31 = vld [vmem:[%s3434_s13 + $0xa0] sm:$0xf0] }
  0xdd   : > { %1507 = vmatmul.bf16.gmra.mxu1 %v4064_v14  ;;  %3004 = vmatmul.msk.bf16.gmra.mxu2 %vm1224_vm0, %v4066_v56  ;;  %v1459_v43 = vpop.f32.mrf.mxu0  ;;  %v4092_v51 = vor.u32 %v3137_v31, %v2469_v34 }
  0xde   : > { %v4068_v24 = vadd.f32 %v1456_v20, %v1408_v15  ;;  %v1266_v20 = vadd.f32 %v1265_v0, %v3971_v13  ;;  %v1269_v0 = vadd.f32 %v3939_v52, %v3971_v13  ;;  %v3211_v52 = vld [vmem:[%s4772_s1 + $0x134] sm:$0xf] }
  0xe0   : > { %1605 = vmatmul.bf16.gmra.mxu3 %v3634_v61  ;;  %v1361_v28 = vpop.f32.mrf.mxu2  ;;  %1654 = vmatmul.bf16.gmra.mxu0 %v3718_v53  ;;  %v2463_v61 = vld [vmem:[%s3434_s13 + $0x9c] sm:$0xf0] }
  0xe1   : > { %v1362_v17 = vadd.f32 %v1361_v28, %v1313_v18  ;;  %v4090_v18 = vor.u32 %v3133_v9, %v2463_v61 }
  0xe2   : > { %v1314_v60 = vpop.f32.mrf.mxu1 }
  0xe3   : > { %v1410_v29 = vpop.f32.mrf.mxu3  ;;  %v1315_v39 = vadd.f32 %v1314_v60, %v1266_v20 }
  0xe4   : > { %v1411_v50 = vadd.f32 %v1410_v29, %v1362_v17  ;;  %v2767_v17 = vld [vmem:[%s4772_s1 + $0x138] sm:$0xf0] }
  0xe5   : > { %v1461_v12 = vpop.f32.mrf.mxu0  ;;  %v2770_v60 = vor.u32 %v3211_v52, %v2767_v17  ;;  %v1274_v52 = vadd.f32 %v4001_v5, %v3971_v13  ;;  %v3209_v5 = vld [vmem:[%s4772_s1 + $0x124] sm:$0xf] }
  0xe6   : > { %v4082_v62 = vadd.f32 %v1459_v43, %v1411_v50  ;;  %v1271_v50 = vadd.f32 %v3983_v25, %v3971_v13 }
  0xe7   : > { %1694 = vmatpush.bf16.msrb.mxu1 %v2770_v60 }
  0xe8   : > { %v1363_v15 = vpop.f32.mrf.mxu2 }
  0xe9   : > { %v1364_v36 = vadd.f32 %v1363_v15, %v1315_v39 }
  0xea   : > { %v1317_v53 = vpop.f32.mrf.mxu1 }
  0xeb   : > { %v1412_v46 = vpop.f32.mrf.mxu3  ;;  %v1318_v20 = vadd.f32 %v1317_v53, %v1269_v0  ;;  %v3140_v0 = vld [vmem:[%s3434_s13 + $0xbc] sm:$0xf] }
  0xec   : > { %v1413_v28 = vadd.f32 %v1412_v46, %v1364_v36  ;;  %v2491_v36 = vld [vmem:[%s3434_s13 + $0xd4] sm:$0xf0]  ;;  %v2497_v46 = vld [vmem:[%s3434_s13 + $0xc0] sm:$0xf]  ;;  %v3144_v53 = vld [vmem:[%s3434_s13 + $0xd8] sm:$0xf0] }
  0xed   : > { %1512 = vmatmul.bf16.gmra.mxu1 %v4090_v18  ;;  %3005 = vmatmul.msk.bf16.gmra.mxu2 %vm1224_vm0, %v4092_v51  ;;  %v1464_v29 = vpop.f32.mrf.mxu0  ;;  %v4119_v60 = vor.u32 %v3144_v53, %v2497_v46 }
  0xee   : > { %v4094_v43 = vadd.f32 %v1461_v12, %v1413_v28 }
  0xf0   : > { %1610 = vmatmul.bf16.gmra.mxu3 %v3481_v44  ;;  %v1366_v39 = vpop.f32.mrf.mxu2  ;;  %1659 = vmatmul.bf16.gmra.mxu0 %v3744_v6 }
  0xf1   : > { %v1367_v9 = vadd.f32 %v1366_v39, %v1318_v20  ;;  %v4117_v20 = vor.u32 %v3140_v0, %v2491_v36 }
  0xf2   : > { %v1319_v61 = vpop.f32.mrf.mxu1 }
  0xf3   : > { %v1415_v12 = vpop.f32.mrf.mxu3  ;;  %v1320_v34 = vadd.f32 %v1319_v61, %v1271_v50 }
  0xf4   : > { %v1416_v31 = vadd.f32 %v1415_v12, %v1367_v9  ;;  %v2759_v9 = vld [vmem:[%s4772_s1 + $0x128] sm:$0xf0] }
  0xf5   : > { %v1466_v44 = vpop.f32.mrf.mxu0  ;;  %v2762_v61 = vor.u32 %v3209_v5, %v2759_v9 }
  0xf6   : > { %v4109_v15 = vadd.f32 %v1464_v29, %v1416_v31  ;;  %v1276_v31 = vadd.f32 %v4025_v57, %v3971_v13 }
  0xf7   : > { %1695 = vmatpush.bf16.msrb.mxu1 %v2762_v61 }
  0xf8   : > { %v1368_v28 = vpop.f32.mrf.mxu2 }
  0xf9   : > { %v1369_v17 = vadd.f32 %v1368_v28, %v1320_v34 }
  0xfa   : > { %v1322_v6 = vpop.f32.mrf.mxu1 }
  0xfb   : > { %v1417_v25 = vpop.f32.mrf.mxu3  ;;  %v1323_v39 = vadd.f32 %v1322_v6, %v1274_v52  ;;  %v3147_v52 = vld [vmem:[%s3434_s13 + $0xf4] sm:$0xf] }
  0xfc   : > { %v1418_v50 = vadd.f32 %v1417_v25, %v1369_v17  ;;  %v2519_v17 = vld [vmem:[%s3434_s13 + $0x10c] sm:$0xf0]  ;;  %v2525_v25 = vld [vmem:[%s3434_s13 + $0xf8] sm:$0xf]  ;;  %v3151_v6 = vld [vmem:[%s3434_s13 + $0x110] sm:$0xf0] }
  0xfd   : > { %1517 = vmatmul.bf16.gmra.mxu1 %v4117_v20  ;;  %3006 = vmatmul.msk.bf16.gmra.mxu2 %vm1224_vm0, %v4119_v60  ;;  %v1469_v12 = vpop.f32.mrf.mxu0  ;;  %v4142_v61 = vor.u32 %v3147_v52, %v2519_v17  ;;  %v4144_v13 = vor.u32 %v3151_v6, %v2525_v25  ;;  %v2927_v52 = vld [vmem:[%s4772_s1 + $0x278] sm:$0xf0]  ;;  %v3233_v17 = vld [vmem:[%s4772_s1 + $0x1e4] sm:$0xf]  ;;  %v2855_v25 = vld [vmem:[%s4772_s1 + $0x1e8] sm:$0xf0] }
  0xfe   : > { %v4121_v29 = vadd.f32 %v1466_v44, %v1418_v50 }
 0x100   : > { %1615 = vmatmul.bf16.gmra.mxu3 %v3597_v40  ;;  %v1371_v34 = vpop.f32.mrf.mxu2  ;;  %1664 = vmatmul.bf16.gmra.mxu0 %v3770_v21 }
 0x101   : > { %v1372_v0 = vadd.f32 %v1371_v34, %v1323_v39  ;;  %v2863_v34 = vld [vmem:[%s4772_s1 + $0x1f8] sm:$0xf0] }
 0x102   : > { %v1324_v36 = vpop.f32.mrf.mxu1 }
 0x103   : > { %v1420_v44 = vpop.f32.mrf.mxu3  ;;  %v1325_v46 = vadd.f32 %v1324_v36, %v1276_v31  ;;  %v3251_v36 = vld [vmem:[%s4772_s1 + $0x274] sm:$0xf] }
 0x104   : > { %v1421_v53 = vadd.f32 %v1420_v44, %v1372_v0  ;;  %v2751_v44 = vld [vmem:[%s4772_s1 + $0x118] sm:$0xf0] }
 0x105   : > { %v1471_v40 = vpop.f32.mrf.mxu0 }
 0x106   : > { %v4136_v28 = vadd.f32 %v1469_v12, %v1421_v53  ;;  %v3235_v12 = vld [vmem:[%s4772_s1 + $0x1f4] sm:$0xf] }
 0x107   : > { %v2866_v31 = vor.u32 %v3235_v12, %v2863_v34 }
 0x108   : > { %v1373_v50 = vpop.f32.mrf.mxu2 }
 0x109   : > { %v1374_v5 = vadd.f32 %v1373_v50, %v1325_v46  ;;  %1739 = vmatpush.bf16.msrb.mxu2 %v2866_v31  ;;  %v2847_v31 = vld [vmem:[%s4772_s1 + $0x1d8] sm:$0xf0] }
 0x10a   : > { %v1327_v57 = vpop.f32.mrf.mxu1 }
 0x10b   : > { %v1422_v9 = vpop.f32.mrf.mxu3  ;;  %v1328_v21 = vadd.f32 %v1327_v57, %v3974_v16  ;;  %v3207_v16 = vld [vmem:[%s4772_s1 + $0x114] sm:$0xf]  ;;  %v2919_v57 = vld [vmem:[%s4772_s1 + $0x268] sm:$0xf0] }
 0x10c   : > { %v1423_v39 = vadd.f32 %v1422_v9, %v1374_v5  ;;  %v2754_v53 = vor.u32 %v3207_v16, %v2751_v44  ;;  %v3249_v9 = vld [vmem:[%s4772_s1 + $0x264] sm:$0xf]  ;;  %v3154_v16 = vld [vmem:[%s3434_s13 + $0x12c] sm:$0xf]  ;;  %v2547_v44 = vld [vmem:[%s3434_s13 + $0x144] sm:$0xf0] }
 0x10d   : > { %1522 = vmatmul.bf16.gmra.mxu1 %v4142_v61  ;;  %3007 = vmatmul.msk.bf16.gmra.mxu2 %vm1224_vm0, %v4144_v13  ;;  %v1474_v46 = vpop.f32.mrf.mxu0  ;;  %v2922_v12 = vor.u32 %v3249_v9, %v2919_v57  ;;  %v2839_v9 = vld [vmem:[%s4772_s1 + $0x1c8] sm:$0xf0] }
 0x10e   : > { %v4153_v0 = vadd.f32 %v1471_v40, %v1423_v39  ;;  %v2930_v40 = vor.u32 %v3251_v36, %v2927_v52  ;;  %1696 = vmatpush.bf16.msrb.mxu1 %v2754_v53  ;;  %v3247_v52 = vld [vmem:[%s4772_s1 + $0x254] sm:$0xf] }
 0x110   : > { %1620 = vmatmul.bf16.gmra.mxu3 %v3483_v45  ;;  %v1376_v6 = vpop.f32.mrf.mxu2  ;;  %v2858_v45 = vor.u32 %v3233_v17, %v2855_v25  ;;  %1669 = vmatmul.bf16.gmra.mxu0 %v3796_v42  ;;  %v3231_v42 = vld [vmem:[%s4772_s1 + $0x1d4] sm:$0xf]  ;;  %v2553_v25 = vld [vmem:[%s3434_s13 + $0x130] sm:$0xf] }
 0x111   : > { %v1377_v50 = vadd.f32 %v1376_v6, %v1328_v21  ;;  %1788 = vmatpush.bf16.msrb.mxu3 %v2930_v40  ;;  %v2850_v36 = vor.u32 %v3231_v42, %v2847_v31  ;;  %v3267_v40 = vld [vmem:[%s4772_s1 + $0x2f4] sm:$0xf]  ;;  %v3158_v6 = vld [vmem:[%s3434_s13 + $0x148] sm:$0xf0]  ;;  %v4215_v42 = vor.u32 %v3154_v16, %v2547_v44 }
 0x112   : > { %v1329_v39 = vpop.f32.mrf.mxu1  ;;  %1740 = vmatpush.bf16.msrb.mxu2 %v2858_v45  ;;  %v4217_v31 = vor.u32 %v3158_v6, %v2553_v25  ;;  %v2983_v16 = vld [vmem:[%s4772_s1 + $0x2e8] sm:$0xf0] }
 0x113   : > { %v1425_v5 = vpop.f32.mrf.mxu3  ;;  %v1330_v34 = vadd.f32 %v1329_v39, %v3995_v63  ;;  %v2911_v63 = vld [vmem:[%s4772_s1 + $0x258] sm:$0xf0] }
 0x114   : > { %v1426_v21 = vadd.f32 %v1425_v5, %v1377_v50  ;;  %v2914_v45 = vor.u32 %v3247_v52, %v2911_v63  ;;  %v3229_v5 = vld [vmem:[%s4772_s1 + $0x1c4] sm:$0xf]  ;;  %4806 = vst [vmem:[#allocation15_spill] sm:$0xff] %v4217_v31  ;;  %v2903_v52 = vld [vmem:[%s4772_s1 + $0x248] sm:$0xf0] }
 0x115   : > { %1789 = vmatpush.bf16.msrb.mxu3 %v2922_v12  ;;  %v1476_v17 = vpop.f32.mrf.mxu0  ;;  %v2842_v39 = vor.u32 %v3229_v5, %v2839_v9  ;;  %v3265_v63 = vld [vmem:[%s4772_s1 + $0x2e4] sm:$0xf]  ;;  %v2743_v5 = vld [vmem:[%s4772_s1 + $0x108] sm:$0xf0] }
 0x116   : > { %v4193_v53 = vadd.f32 %v1474_v46, %v1426_v21  ;;  %1741 = vmatpush.bf16.msrb.mxu2 %v2850_v36  ;;  %v2991_v46 = vld [vmem:[%s4772_s1 + $0x2f8] sm:$0xf0]  ;;  %v3245_v36 = vld [vmem:[%s4772_s1 + $0x244] sm:$0xf]  ;;  %v2986_v6 = vor.u32 %v3265_v63, %v2983_v16 }
 0x117   : > { %v2994_v50 = vor.u32 %v3267_v40, %v2991_v46  ;;  %v2906_v25 = vor.u32 %v3245_v36, %v2903_v52  ;;  %v2831_v46 = vld [vmem:[%s4772_s1 + $0x1b8] sm:$0xf0] }
 0x118   : > { %v1378_v57 = vpop.f32.mrf.mxu2  ;;  %v2975_v36 = vld [vmem:[%s4772_s1 + $0x2d8] sm:$0xf0] }
 0x119   : > { %v1379_v12 = vadd.f32 %v1378_v57, %v1330_v34  ;;  %1790 = vmatpush.bf16.msrb.mxu3 %v2914_v45  ;;  %1837 = vmatpush.bf16.msrb.mxu0 %v2994_v50  ;;  %v3227_v45 = vld [vmem:[%s4772_s1 + $0x1b4] sm:$0xf] }
 0x11a   : > { %v1332_v34 = vpop.f32.mrf.mxu1  ;;  %1742 = vmatpush.bf16.msrb.mxu2 %v2842_v39  ;;  %v2834_v9 = vor.u32 %v3227_v45, %v2831_v46  ;;  %v3243_v57 = vld [vmem:[%s4772_s1 + $0x234] sm:$0xf]  ;;  %v2887_v46 = vld [vmem:[%s4772_s1 + $0x228] sm:$0xf0] }
 0x11b   : > { %v1427_v21 = vpop.f32.mrf.mxu3  ;;  %v1333_v44 = vadd.f32 %v1332_v34, %v4022_v48  ;;  %v3205_v48 = vld [vmem:[%s4772_s1 + $0x104] sm:$0xf]  ;;  %v2823_v34 = vld [vmem:[%s4772_s1 + $0x1a8] sm:$0xf0] }
 0x11c   : > { %v1428_v40 = vadd.f32 %v1427_v21, %v1379_v12  ;;  %v2746_v39 = vor.u32 %v3205_v48, %v2743_v5  ;;  %v2895_v12 = vld [vmem:[%s4772_s1 + $0x238] sm:$0xf0]  ;;  %v3263_v21 = vld [vmem:[%s4772_s1 + $0x2d4] sm:$0xf]  ;;  %v3261_v48 = vld [vmem:[%s4772_s1 + $0x2c4] sm:$0xf] }
 0x11d   : > { %1527 = vmatmul.bf16.gmra.mxu1 %v4215_v42  ;;  %3008 = vmatmul.msk.bf16.gmra.mxu2 %vm1224_vm0, %v4217_v31  ;;  %v2898_v52 = vor.u32 %v3243_v57, %v2895_v12  ;;  %v2978_v63 = vor.u32 %v3263_v21, %v2975_v36  ;;  %v3223_v12 = vld [vmem:[%s4772_s1 + $0x194] sm:$0xf]  ;;  %v2815_v21 = vld [vmem:[%s4772_s1 + $0x198] sm:$0xf0]  ;;  %v3161_v36 = vld [vmem:[%s3434_s13 + $0x164] sm:$0xf] }
 0x11e   : > { %v4238_v50 = vadd.f32 %v1476_v17, %v1428_v40  ;;  %v1479_v17 = vpop.f32.mrf.mxu0  ;;  %1838 = vmatpush.bf16.msrb.mxu0 %v2986_v6  ;;  %1791 = vmatpush.bf16.msrb.mxu3 %v2906_v25  ;;  %v3241_v25 = vld [vmem:[%s4772_s1 + $0x224] sm:$0xf] }
 0x11f   : > { %1743 = vmatpush.bf16.msrb.mxu2 %v2834_v9  ;;  %1697 = vmatpush.bf16.msrb.mxu1 %v2746_v39 }
 0x120   : > { %1625 = vmatmul.bf16.gmra.mxu3 %v3599_v41  ;;  %v3225_v41 = vld [vmem:[%s4772_s1 + $0x1a4] sm:$0xf]  ;;  %v1381_v16 = vpop.f32.mrf.mxu2  ;;  %1674 = vmatmul.bf16.gmra.mxu0 %v3846_v19  ;;  %v2967_v19 = vld [vmem:[%s4772_s1 + $0x2c8] sm:$0xf0] }
 0x121   : > { %v2826_v40 = vor.u32 %v3225_v41, %v2823_v34  ;;  %v1382_v6 = vadd.f32 %v1381_v16, %v1333_v44  ;;  %v2890_v44 = vor.u32 %v3241_v25, %v2887_v46  ;;  %v2970_v39 = vor.u32 %v3261_v48, %v2967_v19  ;;  %v3259_v16 = vld [vmem:[%s4772_s1 + $0x2b4] sm:$0xf]  ;;  %v3221_v48 = vld [vmem:[%s4772_s1 + $0x184] sm:$0xf] }
 0x122   : > { %v1334_v5 = vpop.f32.mrf.mxu1  ;;  %1839 = vmatpush.bf16.msrb.mxu0 %v2978_v63  ;;  %1792 = vmatpush.bf16.msrb.mxu3 %v2898_v52  ;;  %v2575_v63 = vld [vmem:[%s3434_s13 + $0x17c] sm:$0xf0]  ;;  %v2818_v41 = vor.u32 %v3223_v12, %v2815_v21  ;;  %v2879_v52 = vld [vmem:[%s4772_s1 + $0x218] sm:$0xf0] }
 0x123   : > { %v1430_v45 = vpop.f32.mrf.mxu3  ;;  %v1335_v9 = vadd.f32 %v1334_v5, %v4036_v30  ;;  %1744 = vmatpush.bf16.msrb.mxu2 %v2826_v40  ;;  %v3239_v30 = vld [vmem:[%s4772_s1 + $0x214] sm:$0xf]  ;;  %v2807_v5 = vld [vmem:[%s4772_s1 + $0x188] sm:$0xf0]  ;;  %v4312_v21 = vor.u32 %v3161_v36, %v2575_v63 }
 0x124   : > { %v1431_v57 = vadd.f32 %v1430_v45, %v1382_v6  ;;  %v2581_v6 = vld [vmem:[%s3434_s13 + $0x168] sm:$0xf]  ;;  %v3165_v45 = vld [vmem:[%s3434_s13 + $0x180] sm:$0xf0]  ;;  %v2882_v25 = vor.u32 %v3239_v30, %v2879_v52  ;;  %v2951_v36 = vld [vmem:[%s4772_s1 + $0x2a8] sm:$0xf0] }
 0x125   : > { %v4314_v31 = vor.u32 %v3165_v45, %v2581_v6  ;;  %v3257_v30 = vld [vmem:[%s4772_s1 + $0x2a4] sm:$0xf] }
 0x126   : > { %v4290_v34 = vadd.f32 %v1479_v17, %v1431_v57  ;;  %v1481_v40 = vpop.f32.mrf.mxu0  ;;  %1840 = vmatpush.bf16.msrb.mxu0 %v2970_v39  ;;  %v2959_v17 = vld [vmem:[%s4772_s1 + $0x2b8] sm:$0xf0]  ;;  %1793 = vmatpush.bf16.msrb.mxu3 %v2890_v44  ;;  %v2810_v57 = vor.u32 %v3221_v48, %v2807_v5  ;;  %v3237_v44 = vld [vmem:[%s4772_s1 + $0x204] sm:$0xf]  ;;  %v2954_v6 = vor.u32 %v3257_v30, %v2951_v36 }
 0x127   : > { %1745 = vmatpush.bf16.msrb.mxu2 %v2818_v41  ;;  %v2962_v46 = vor.u32 %v3259_v16, %v2959_v17  ;;  %v2871_v41 = vld [vmem:[%s4772_s1 + $0x208] sm:$0xf0]  ;;  %v3269_v17 = vld [vmem:[%s4772_s1 + $0x304] sm:$0xf]  ;;  %v2943_v48 = vld [vmem:[%s4772_s1 + $0x298] sm:$0xf0] }
 0x128   : > { %v1383_v19 = vpop.f32.mrf.mxu2  ;;  %v3168_v36 = vld [vmem:[%s3434_s13 + $0x19c] sm:$0xf] }
 0x129   : > { %v1384_v12 = vadd.f32 %v1383_v19, %v1335_v9  ;;  %v2874_v9 = vor.u32 %v3237_v44, %v2871_v41 }
 0x12a   : > { %v1337_v52 = vpop.f32.mrf.mxu1  ;;  %1841 = vmatpush.bf16.msrb.mxu0 %v2962_v46  ;;  %1794 = vmatpush.bf16.msrb.mxu3 %v2882_v25  ;;  %v2999_v46 = vld [vmem:[%s4772_s1 + $0x308] sm:$0xf0] }
 0x12b   : > { %v1432_v39 = vpop.f32.mrf.mxu3  ;;  %v1338_v63 = vadd.f32 %v1337_v52, %v3986_v27  ;;  %1746 = vmatpush.bf16.msrb.mxu2 %v2810_v57  ;;  %v3255_v27 = vld [vmem:[%s4772_s1 + $0x294] sm:$0xf]  ;;  %v3002_v25 = vor.u32 %v3269_v17, %v2999_v46 }
 0x12c   : > { %v1433_v16 = vadd.f32 %v1432_v39, %v1384_v12  ;;  %v2946_v5 = vor.u32 %v3255_v27, %v2943_v48  ;;  %v2935_v39 = vld [vmem:[%s4772_s1 + $0x288] sm:$0xf0] }
 0x12d   : > { %1532 = vmatmul.bf16.gmra.mxu1 %v4312_v21  ;;  %3009 = vmatmul.msk.bf16.gmra.mxu2 %vm1224_vm0, %v4314_v31 }
 0x12e   : > { %v4329_v45 = vadd.f32 %v1481_v40, %v1433_v16  ;;  %v1484_v40 = vpop.f32.mrf.mxu0  ;;  %1842 = vmatpush.bf16.msrb.mxu0 %v2954_v6  ;;  %1795 = vmatpush.bf16.msrb.mxu3 %v2874_v9  ;;  %v2603_v16 = vld [vmem:[%s3434_s13 + $0x1b4] sm:$0xf0]  ;;  %v3172_v6 = vld [vmem:[%s3434_s13 + $0x1b8] sm:$0xf0] }
 0x12f   : > { %1893 = vmatpush.bf16.msra.mxu1 %v3002_v25  ;;  %v4361_v25 = vor.u32 %v3168_v36, %v2603_v16 }
 0x130   : > { %1630 = vmatmul.bf16.gmra.mxu3 %v3494_v49  ;;  %v1386_v19 = vpop.f32.mrf.mxu2  ;;  %1679 = vmatmul.bf16.gmra.mxu0 %v3926_v35  ;;  %v3253_v49 = vld [vmem:[%s4772_s1 + $0x284] sm:$0xf]  ;;  %v2609_v35 = vld [vmem:[%s3434_s13 + $0x1a0] sm:$0xf] }
 0x131   : > { %v1387_v57 = vadd.f32 %v1386_v19, %v1338_v63  ;;  %v2938_v41 = vor.u32 %v3253_v49, %v2935_v39  ;;  %v4363_v48 = vor.u32 %v3172_v6, %v2609_v35 }
 0x132   : > { %v1339_v44 = vpop.f32.mrf.mxu1  ;;  %1843 = vmatpush.bf16.msrb.mxu0 %v2946_v5 }
 0x133   : > { %v1435_v12 = vpop.f32.mrf.mxu3  ;;  %v1340_v30 = vadd.f32 %v1339_v44, %v4004_v10 }
 0x134   : > { %v1436_v52 = vadd.f32 %v1435_v12, %v1387_v57 }
 0x136   : > { %v4355_v9 = vadd.f32 %v1484_v40, %v1436_v52  ;;  %v1486_v63 = vpop.f32.mrf.mxu0  ;;  %1844 = vmatpush.bf16.msrb.mxu0 %v2938_v41 }
 0x138   : > { %v1388_v17 = vpop.f32.mrf.mxu2 }
 0x139   : > { %v1389_v46 = vadd.f32 %v1388_v17, %v1340_v30 }
 0x13a   : > { %v1342_v5 = vpop.f32.mrf.mxu1 }
 0x13b   : > { %v1437_v27 = vpop.f32.mrf.mxu3  ;;  %v1343_v19 = vadd.f32 %v1342_v5, %v4028_v59 }
 0x13c   : > { %v1438_v10 = vadd.f32 %v1437_v27, %v1389_v46 }
 0x13d   : > { %1537 = vmatmul.bf16.gmra.mxu1 %v4361_v25  ;;  %3010 = vmatmul.msk.bf16.gmra.mxu2 %vm1224_vm0, %v4363_v48 }
 0x13e   : > { %v4366_v57 = vadd.f32 %v1486_v63, %v1438_v10  ;;  %v1489_v40 = vpop.f32.mrf.mxu0 }
 0x140   : > { %1635 = vmatmul.bf16.gmra.mxu3 %v3610_v47  ;;  %v1391_v12 = vpop.f32.mrf.mxu2  ;;  %1684 = vmatmul.bf16.gmra.mxu0 %v3997_v3 }
 0x141   : > { %v1392_v49 = vadd.f32 %v1391_v12, %v1343_v19 }
 0x142   : > { %v1344_v44 = vpop.f32.mrf.mxu1 }
 0x143   : > { %v1440_v39 = vpop.f32.mrf.mxu3  ;;  %v1345_v41 = vadd.f32 %v1344_v44, %v4043_v2  ;;  %v4383_v2 = vperm.slane %v3951_v1, 1 }
 0x144   : > { %v1441_v59 = vadd.f32 %v1440_v39, %v1392_v49 }
 0x146   : > { %v4374_v30 = vadd.f32 %v1489_v40, %v1441_v59  ;;  %v1491_v52 = vpop.f32.mrf.mxu0 }
 0x148   : > { %v1393_v36 = vpop.f32.mrf.mxu2 }
 0x149   : > { %v1394_v63 = vadd.f32 %v1393_v36, %v1345_v41 }
 0x14a   : > { %v1503_v35 = vpop.f32.mrf.mxu1 }
 0x14b   : > { %v1442_v16 = vpop.f32.mrf.mxu3  ;;  %v1504_v47 = vadd.f32 %v1503_v35, %v4057_v38 }
 0x14c   : > { %v1443_v6 = vadd.f32 %v1442_v16, %v1394_v63 }
 0x14d   : > { %1698 = vmatmul.bf16.vlgmr.msrb.gmra.mxu1 %v3694_v32  ;;  %1747 = vmatmul.bf16.vlgmr.msrb.gmra.mxu2 %v3696_v33 }
 0x14e   : > { %v4377_v17 = vadd.f32 %v1491_v52, %v1443_v6  ;;  %v1650_v3 = vpop.f32.mrf.mxu0 }
 0x150   : > { %1796 = vmatmul.bf16.vlgmr.msrb.gmra.mxu3 %v3702_v37  ;;  %v1552_v46 = vpop.f32.mrf.mxu2  ;;  %1845 = vmatmul.bf16.vlgmr.msrb.gmra.mxu0 %v4038_v4 }
 0x151   : > { %v4385_v27 = vadd.f32 %v1552_v46, %v1504_v47 }
 0x152   : > { %v1505_v19 = vpop.f32.mrf.mxu1 }
 0x153   : > { %v1601_v5 = vpop.f32.mrf.mxu3  ;;  %v1506_v10 = vadd.f32 %v1505_v19, %v4068_v24 }
 0x154   : > { %v1602_v38 = vadd.f32 %v1601_v5, %v4383_v2 }
 0x156   : > { %v4390_v32 = vadd.f32 %v1650_v3, %v1602_v38  ;;  %v1652_v33 = vpop.f32.mrf.mxu0 }
 0x158   : > { %v1554_v40 = vpop.f32.mrf.mxu2 }
 0x159   : > { %v4392_v37 = vadd.f32 %v1554_v40, %v1506_v10 }
 0x15a   : > { %v1508_v12 = vpop.f32.mrf.mxu1 }
 0x15b   : > { %v1603_v1 = vpop.f32.mrf.mxu3  ;;  %v1935_v39 = vpack.c.bf16 %v4392_v37, %v4385_v27  ;;  %v1509_v4 = vadd.f32 %v1508_v12, %v4082_v62 }
 0x15c   : > { %v1604_v49 = vadd.f32 %v1603_v1, %v4383_v2 }
 0x15d   : > { %1703 = vmatmul.bf16.gmra.mxu1 %v3720_v54  ;;  %1752 = vmatmul.bf16.gmra.mxu2 %v3722_v55 }
 0x15e   : > { %v4398_v44 = vadd.f32 %v1652_v33, %v1604_v49  ;;  %v1655_v24 = vpop.f32.mrf.mxu0 }
 0x160   : > { %1801 = vmatmul.bf16.gmra.mxu3 %v3728_v58  ;;  %v1557_v41 = vpop.f32.mrf.mxu2  ;;  %1850 = vmatmul.bf16.gmra.mxu0 %v4064_v14 }
 0x161   : > { %v4403_v59 = vadd.f32 %v1557_v41, %v1509_v4 }
 0x162   : > { %v1510_v36 = vpop.f32.mrf.mxu1 }
 0x163   : > { %v1606_v52 = vpop.f32.mrf.mxu3  ;;  %v1511_v62 = vadd.f32 %v1510_v36, %v4094_v43 }
 0x164   : > { %v1607_v63 = vadd.f32 %v1606_v52, %v4383_v2 }
 0x166   : > { %v4408_v16 = vadd.f32 %v1655_v24, %v1607_v63  ;;  %v1657_v35 = vpop.f32.mrf.mxu0 }
 0x168   : > { %v1559_v54 = vpop.f32.mrf.mxu2 }
 0x169   : > { %v4410_v6 = vadd.f32 %v1559_v54, %v1511_v62 }
 0x16a   : > { %v1513_v58 = vpop.f32.mrf.mxu1 }
 0x16b   : > { %v1608_v55 = vpop.f32.mrf.mxu3  ;;  %v1937_v3 = vpack.c.bf16 %v4410_v6, %v4403_v59  ;;  %v1514_v14 = vadd.f32 %v1513_v58, %v4109_v15 }
 0x16c   : > { %v1609_v47 = vadd.f32 %v1608_v55, %v4383_v2 }
 0x16d   : > { %1708 = vmatmul.bf16.gmra.mxu1 %v3746_v7  ;;  %1757 = vmatmul.bf16.gmra.mxu2 %v3748_v8 }
 0x16e   : > { %v4416_v46 = vadd.f32 %v1657_v35, %v1609_v47  ;;  %v1660_v43 = vpop.f32.mrf.mxu0 }
 0x170   : > { %1806 = vmatmul.bf16.gmra.mxu3 %v3754_v11  ;;  %v1562_v5 = vpop.f32.mrf.mxu2  ;;  %1855 = vmatmul.bf16.gmra.mxu0 %v4090_v18 }
 0x171   : > { %v4421_v19 = vadd.f32 %v1562_v5, %v1514_v14  ;;  %v4808_v5 = vld [vmem:[#allocation3_spill] sm:$0xff] }
 0x172   : > { %v1515_v10 = vpop.f32.mrf.mxu1 }
 0x173   : > { %v1611_v38 = vpop.f32.mrf.mxu3  ;;  %v1516_v15 = vadd.f32 %v1515_v10, %v4121_v29 }
 0x174   : > { %v1612_v33 = vadd.f32 %v1611_v38, %v4383_v2  ;;  %v4809_v38 = vld [vmem:[#allocation4_spill] sm:$0xff] }
 0x176   : > { %v4426_v40 = vadd.f32 %v1660_v43, %v1612_v33  ;;  %v1662_v1 = vpop.f32.mrf.mxu0  ;;  %v4807_v43 = vld [vmem:[#allocation2_spill] sm:$0xff] }
 0x178   : > { %v1564_v7 = vpop.f32.mrf.mxu2 }
 0x179   : > { %v4428_v12 = vadd.f32 %v1564_v7, %v1516_v15  ;;  %v3277_v15 = vld [vmem:[%s4774_s3 + $0x30] sm:$0xff] }
 0x17a   : > { %v1518_v11 = vpop.f32.mrf.mxu1 }
 0x17b   : > { %v1613_v8 = vpop.f32.mrf.mxu3  ;;  %v1939_v4 = vpack.c.bf16 %v4428_v12, %v4421_v19  ;;  %v1519_v18 = vadd.f32 %v1518_v11, %v4136_v28 }
 0x17c   : > { %v1614_v49 = vadd.f32 %v1613_v8, %v4383_v2 }
 0x17d   : > { %1713 = vmatmul.bf16.gmra.mxu1 %v3772_v22  ;;  %1762 = vmatmul.bf16.gmra.mxu2 %v3774_v23 }
 0x17e   : > { %v4434_v24 = vadd.f32 %v1662_v1, %v1614_v49  ;;  %v1665_v29 = vpop.f32.mrf.mxu0 }
 0x180   : > { %1811 = vmatmul.bf16.gmra.mxu3 %v3780_v26  ;;  %v1567_v41 = vpop.f32.mrf.mxu2  ;;  %1860 = vmatmul.bf16.gmra.mxu0 %v4117_v20 }
 0x181   : > { %v4439_v52 = vadd.f32 %v1567_v41, %v1519_v18  ;;  %v3276_v18 = vld [vmem:[%s4774_s3 + $0x28] sm:$0xff] }
 0x182   : > { %v1520_v63 = vpop.f32.mrf.mxu1 }
 0x183   : > { %v1616_v36 = vpop.f32.mrf.mxu3  ;;  %v1521_v28 = vadd.f32 %v1520_v63, %v4153_v0  ;;  %v3278_v0 = vld [vmem:[%s4774_s3 + $0x38] sm:$0xff] }
 0x184   : > { %v1617_v62 = vadd.f32 %v1616_v36, %v4383_v2  ;;  %2083 = vmatpush.bf16.msra.mxu2 %v3278_v0  ;;  %v3273_v0 = vld [vmem:[%s4774_s3 + $0x10] sm:$0xff] }
 0x186   : > { %v4444_v35 = vadd.f32 %v1665_v29, %v1617_v62  ;;  %v1667_v54 = vpop.f32.mrf.mxu0 }
 0x188   : > { %v1569_v22 = vpop.f32.mrf.mxu2  ;;  %2084 = vmatpush.bf16.msra.mxu2 %v3277_v15  ;;  %v3272_v15 = vld [vmem:[%s4774_s3 + $0x8] sm:$0xff] }
 0x189   : > { %v4446_v55 = vadd.f32 %v1569_v22, %v1521_v28  ;;  %v4810_v22 = vld [vmem:[#allocation5_spill] sm:$0xff] }
 0x18a   : > { %v1523_v26 = vpop.f32.mrf.mxu1 }
 0x18b   : > { %v1618_v23 = vpop.f32.mrf.mxu3  ;;  %v1941_v47 = vpack.c.bf16 %v4446_v55, %v4439_v52  ;;  %v1524_v20 = vadd.f32 %v1523_v26, %v4193_v53  ;;  %v4812_v26 = vld [vmem:[#allocation7_spill] sm:$0xff] }
 0x18c   : > { %v1619_v58 = vadd.f32 %v1618_v23, %v4383_v2  ;;  %2085 = vmatpush.bf16.msra.mxu2 %v3276_v18  ;;  %v4811_v23 = vld [vmem:[#allocation6_spill] sm:$0xff]  ;;  %v3280_v52 = vld [vmem:[%s4774_s3 + $0x48] sm:$0xff] }
 0x18d   : > { %1718 = vmatmul.bf16.gmra.mxu1 %v4807_v43  ;;  %1767 = vmatmul.bf16.gmra.mxu2 %v4808_v5 }
 0x18e   : > { %v4452_v14 = vadd.f32 %v1667_v54, %v1619_v58  ;;  %v1670_v10 = vpop.f32.mrf.mxu0  ;;  %v3274_v54 = vld [vmem:[%s4774_s3 + $0x18] sm:$0xff] }
 0x190   : > { %1816 = vmatmul.bf16.gmra.mxu3 %v4809_v38  ;;  %v1572_v33 = vpop.f32.mrf.mxu2  ;;  %1865 = vmatmul.bf16.gmra.mxu0 %v4142_v61  ;;  %v3275_v61 = vld [vmem:[%s4774_s3 + $0x20] sm:$0xff] }
 0x191   : > { %v4463_v53 = vadd.f32 %v1572_v33, %v1524_v20  ;;  %2086 = vmatpush.bf16.msra.mxu2 %v3275_v61  ;;  %v4813_v61 = vld [vmem:[#allocation8_spill] sm:$0xff] }
 0x192   : > { %v1525_v7 = vpop.f32.mrf.mxu1 }
 0x193   : > { %v1621_v1 = vpop.f32.mrf.mxu3  ;;  %v1526_v11 = vadd.f32 %v1525_v7, %v4238_v50 }
 0x194   : > { %v1622_v8 = vadd.f32 %v1621_v1, %v4383_v2 }
 0x195   : > { %2087 = vmatpush.bf16.msra.mxu2 %v3274_v54 }
 0x196   : > { %v4468_v49 = vadd.f32 %v1670_v10, %v1622_v8  ;;  %v4473_v29 = vpop.f32.mrf.mxu0 }
 0x198   : > { %v1574_v41 = vpop.f32.mrf.mxu2 }
 0x199   : > { %v4478_v36 = vadd.f32 %v1574_v41, %v1526_v11  ;;  %2088 = vmatpush.bf16.msra.mxu2 %v3273_v0 }
 0x19a   : > { %v1528_v62 = vpop.f32.mrf.mxu1 }
 0x19b   : > { %v4480_v63 = vpop.f32.mrf.mxu3  ;;  %v1943_v50 = vpack.c.bf16 %v4478_v36, %v4463_v53  ;;  %v1529_v28 = vadd.f32 %v1528_v62, %v4290_v34  ;;  %v4814_v62 = vld [vmem:[#allocation9_spill] sm:$0xff] }
 0x19d   : > { %1723 = vmatmul.bf16.gmra.mxu1 %v4810_v22  ;;  %1772 = vmatmul.bf16.gmra.mxu2 %v4811_v23 }
 0x19e   : > { %v1675_v58 = vpop.f32.mrf.mxu0  ;;  %2089 = vmatpush.bf16.msra.mxu2 %v3272_v15 }
 0x1a0   : > { %1821 = vmatmul.bf16.gmra.mxu3 %v4812_v26  ;;  %v1577_v20 = vpop.f32.mrf.mxu2  ;;  %1870 = vmatmul.bf16.gmra.mxu0 %v4215_v42  ;;  %v3271_v42 = vld [vmem:[%s4774_s3] sm:$0xff] }
 0x1a1   : > { %v4494_v43 = vadd.f32 %v1577_v20, %v1529_v28  ;;  %v4815_v28 = vld [vmem:[#allocation10_spill] sm:$0xff] }
 0x1a2   : > { %v1530_v5 = vpop.f32.mrf.mxu1  ;;  %2090 = vmatpush.bf16.msra.mxu2 %v3271_v42  ;;  %v4816_v42 = vld [vmem:[#allocation11_spill] sm:$0xff] }
 0x1a3   : > { %v1626_v34 = vpop.f32.mrf.mxu3  ;;  %v1531_v10 = vadd.f32 %v1530_v5, %v4329_v45 }
 0x1a4   : > { %v1627_v38 = vadd.f32 %v1626_v34, %v4383_v2 }
 0x1a6   : > { %v4499_v33 = vadd.f32 %v1675_v58, %v1627_v38  ;;  %v4504_v1 = vpop.f32.mrf.mxu0 }
 0x1a8   : > { %v1579_v7 = vpop.f32.mrf.mxu2 }
 0x1a9   : > { %v4509_v8 = vadd.f32 %v1579_v7, %v1531_v10 }
 0x1aa   : > { %v1533_v18 = vpop.f32.mrf.mxu1 }
 0x1ab   : > { %v4511_v11 = vpop.f32.mrf.mxu3  ;;  %v1945_v45 = vpack.c.bf16 %v4509_v8, %v4494_v43  ;;  %v1534_v41 = vadd.f32 %v1533_v18, %v4355_v9  ;;  %v3286_v9 = vld [vmem:[%s4774_s3 + $0x78] sm:$0xff]  ;;  %v4817_v18 = vld [vmem:[#allocation12_spill] sm:$0xff] }
 0x1ac   : > { %2132 = vmatpush.bf16.msra.mxu3 %v3286_v9 }
 0x1ad   : > { %1728 = vmatmul.bf16.gmra.mxu1 %v4813_v61  ;;  %1777 = vmatmul.bf16.gmra.mxu2 %v4814_v62 }
 0x1ae   : > { %v1680_v54 = vpop.f32.mrf.mxu0 }
 0x1b0   : > { %1826 = vmatmul.bf16.gmra.mxu3 %v4815_v28  ;;  %v1582_v22 = vpop.f32.mrf.mxu2  ;;  %1875 = vmatmul.bf16.gmra.mxu0 %v4312_v21 }
 0x1b1   : > { %v4519_v23 = vadd.f32 %v1582_v22, %v1534_v41  ;;  %v4818_v41 = vld [vmem:[#allocation13_spill] sm:$0xff] }
 0x1b2   : > { %v1535_v58 = vpop.f32.mrf.mxu1 }
 0x1b3   : > { %v1631_v26 = vpop.f32.mrf.mxu3  ;;  %v1536_v0 = vadd.f32 %v1535_v58, %v4366_v57 }
 0x1b4   : > { %v1632_v20 = vadd.f32 %v1631_v26, %v4383_v2 }
 0x1b6   : > { %v4524_v34 = vadd.f32 %v1680_v54, %v1632_v20  ;;  %v4533_v15 = vpop.f32.mrf.mxu0 }
 0x1b8   : > { %v1584_v5 = vpop.f32.mrf.mxu2 }
 0x1b9   : > { %v4529_v38 = vadd.f32 %v1584_v5, %v1536_v0 }
 0x1ba   : > { %v1538_v21 = vpop.f32.mrf.mxu1 }
 0x1bb   : > { %v4531_v10 = vpop.f32.mrf.mxu3  ;;  %v1947_v7 = vpack.c.bf16 %v4529_v38, %v4519_v23  ;;  %v1539_v57 = vadd.f32 %v1538_v21, %v4374_v30  ;;  %v3285_v30 = vld [vmem:[%s4774_s3 + $0x70] sm:$0xff]  ;;  %v3294_v38 = vld [vmem:[%s4776_s5 + $0x38] sm:$0xff] }
 0x1bc   : > { %2133 = vmatpush.bf16.msra.mxu3 %v3285_v30  ;;  %2257 = vmatpush.bf16.msra.mxu0 %v3294_v38 }
 0x1bd   : > { %1733 = vmatmul.bf16.gmra.mxu1 %v4816_v42  ;;  %1782 = vmatmul.bf16.gmra.mxu2 %v4817_v18 }
 0x1be   : > { %v1685_v58 = vpop.f32.mrf.mxu0 }
 0x1c0   : > { %1831 = vmatmul.bf16.gmra.mxu3 %v4818_v41  ;;  %v1587_v61 = vpop.f32.mrf.mxu2  ;;  %1880 = vmatmul.bf16.gmra.mxu0 %v4361_v25 }
 0x1c1   : > { %v4541_v62 = vadd.f32 %v1587_v61, %v1539_v57  ;;  %v4819_v57 = vld [vmem:[#allocation14_spill] sm:$0xff]  ;;  %v3284_v61 = vld [vmem:[%s4774_s3 + $0x68] sm:$0xff] }
 0x1c2   : > { %v1540_v54 = vpop.f32.mrf.mxu1  ;;  %2134 = vmatpush.bf16.msra.mxu3 %v3284_v61 }
 0x1c3   : > { %v1636_v28 = vpop.f32.mrf.mxu3  ;;  %v1541_v26 = vadd.f32 %v1540_v54, %v4377_v17 }
 0x1c4   : > { %v1637_v22 = vadd.f32 %v1636_v28, %v4383_v2 }
 0x1c6   : > { %v4546_v20 = vadd.f32 %v1685_v58, %v1637_v22  ;;  %v3283_v22 = vld [vmem:[%s4774_s3 + $0x60] sm:$0xff]  ;;  %v3282_v58 = vld [vmem:[%s4774_s3 + $0x58] sm:$0xff] }
 0x1c7   : > { %2135 = vmatpush.bf16.msra.mxu3 %v3283_v22 }
 0x1c8   : > { %v1589_v0 = vpop.f32.mrf.mxu2 }
 0x1c9   : > { %v4551_v9 = vadd.f32 %v1589_v0, %v1541_v26  ;;  %v3281_v0 = vld [vmem:[%s4774_s3 + $0x50] sm:$0xff] }
 0x1ca   : > { %v1699_v5 = vpop.f32.mrf.mxu1 }
 0x1cb   : > { %v1949_v25 = vpack.c.bf16 %v4551_v9, %v4541_v62  ;;  %v1700_v21 = vadd.f32 %v1699_v5, %v4390_v32  ;;  %2136 = vmatpush.bf16.msra.mxu3 %v3282_v58  ;;  %v4630_v55 = vpop.f32.mrf.mxu3  ;;  %v3293_v58 = vld [vmem:[%s4776_s5 + $0x30] sm:$0xff] }
 0x1cc   : > { %2258 = vmatpush.bf16.msra.mxu0 %v3293_v58 }
 0x1cd   : > { %3011 = vmatmul.msk.bf16.vlgmr.msra.gmra.mxu1 %vm1224_vm0, %v4819_v57  ;;  %2091 = vmatmul.bf16.vlgmr.msra.gmra.mxu2 %v1935_v39 }
 0x1cf   : > { %2137 = vmatpush.bf16.msra.mxu3 %v3281_v0 }
 0x1d0   : > { %v1748_v17 = vpop.f32.mrf.mxu2 }
 0x1d1   : > { %v4561_v42 = vadd.f32 %v1748_v17, %v1700_v21 }
 0x1d2   : > { %v1701_v18 = vpop.f32.mrf.mxu1 }
 0x1d3   : > { %v4564_v41 = vadd.f32 %v1701_v18, %v4398_v44  ;;  %2138 = vmatpush.bf16.msra.mxu3 %v3280_v52  ;;  %v1797_v36 = vpop.f32.mrf.mxu3 }
 0x1d8   : > { %v4569_v32 = vpop.f32.mrf.mxu2 }
 0x1da   : > { %v1704_v28 = vpop.f32.mrf.mxu1 }
 0x1db   : > { %v1705_v54 = vadd.f32 %v1704_v28, %v4408_v16  ;;  %v1799_v43 = vpop.f32.mrf.mxu3 }
 0x1dd   : > { %3012 = vmatmul.msk.bf16.gmra.mxu1 %vm1224_vm0, %v4066_v56  ;;  %2096 = vmatmul.bf16.gmra.mxu2 %v1937_v3 }
 0x1e0   : > { %v1753_v27 = vpop.f32.mrf.mxu2 }
 0x1e1   : > { %v4577_v37 = vadd.f32 %v1753_v27, %v1705_v54 }
 0x1e2   : > { %v1706_v39 = vpop.f32.mrf.mxu1 }
 0x1e3   : > { %v4580_v44 = vadd.f32 %v1706_v39, %v4416_v46  ;;  %v1802_v17 = vpop.f32.mrf.mxu3 }
 0x1e8   : > { %v4585_v16 = vpop.f32.mrf.mxu2 }
 0x1ea   : > { %v1709_v26 = vpop.f32.mrf.mxu1 }
 0x1eb   : > { %v1710_v56 = vadd.f32 %v1709_v26, %v4426_v40 }
 0x1ed   : > { %3013 = vmatmul.msk.bf16.gmra.mxu1 %vm1224_vm0, %v4092_v51  ;;  %2101 = vmatmul.bf16.gmra.mxu2 %v1939_v4 }
 0x1f0   : > { %v1758_v59 = vpop.f32.mrf.mxu2 }
 0x1f1   : > { %v4593_v6 = vadd.f32 %v1758_v59, %v1710_v56 }
 0x1f2   : > { %v1711_v3 = vpop.f32.mrf.mxu1 }
 0x1f3   : > { %v4596_v46 = vadd.f32 %v1711_v3, %v4434_v24 }
 0x1f8   : > { %v4601_v40 = vpop.f32.mrf.mxu2 }
 0x1fa   : > { %v1714_v30 = vpop.f32.mrf.mxu1 }
 0x1fb   : > { %v1715_v51 = vadd.f32 %v1714_v30, %v4444_v35  ;;  %v1803_v30 = vadd.f32 %v1802_v17, %v4577_v37 }
 0x1fd   : > { %3014 = vmatmul.msk.bf16.gmra.mxu1 %vm1224_vm0, %v4119_v60  ;;  %2106 = vmatmul.bf16.gmra.mxu2 %v1941_v47 }
 0x200   : > { %v1763_v19 = vpop.f32.mrf.mxu2 }
 0x201   : > { %v4609_v12 = vadd.f32 %v1763_v19, %v1715_v51 }
 0x202   : > { %v1716_v4 = vpop.f32.mrf.mxu1 }
 0x203   : > { %v4612_v24 = vadd.f32 %v1716_v4, %v4452_v14 }
 0x208   : > { %v1765_v54 = vpop.f32.mrf.mxu2 }
 0x20a   : > { %v1719_v35 = vpop.f32.mrf.mxu1 }
 0x20b   : > { %v4618_v5 = vadd.f32 %v1719_v35, %v4468_v49  ;;  %v4820_v49 = vld [vmem:[#allocation15_spill] sm:$0xff] }
 0x20d   : > { %3015 = vmatmul.msk.bf16.gmra.mxu1 %vm1224_vm0, %v4144_v13  ;;  %2111 = vmatmul.bf16.gmra.mxu2 %v1943_v50  ;;  %v4640_v13 = vpop.f32.mrf.mxu0  ;;  %v3279_v50 = vld [vmem:[%s4774_s3 + $0x40] sm:$0xff] }
 0x20e   : > { %2139 = vmatpush.bf16.msra.mxu3 %v3279_v50  ;;  %v3292_v50 = vld [vmem:[%s4776_s5 + $0x28] sm:$0xff] }
 0x20f   : > { %2259 = vmatpush.bf16.msra.mxu0 %v3292_v50 }
 0x212   : > { %v4625_v60 = vpop.f32.mrf.mxu1 }
 0x215   : > { %v1846_v21 = vpop.f32.mrf.mxu0 }
 0x21a   : > { %v1724_v47 = vpop.f32.mrf.mxu1 }
 0x21b   : > { %v4633_v14 = vadd.f32 %v1724_v47, %v4499_v33 }
 0x21d   : > { %3016 = vmatmul.msk.bf16.gmra.mxu1 %vm1224_vm0, %v4820_v49  ;;  %2116 = vmatmul.bf16.gmra.mxu2 %v1945_v45  ;;  %v1848_v8 = vpop.f32.mrf.mxu0 }
 0x222   : > { %v4642_v53 = vpop.f32.mrf.mxu1 }
 0x225   : > { %v1851_v28 = vpop.f32.mrf.mxu0 }
 0x226   : > { %v1852_v4 = vadd.f32 %v1851_v28, %v1803_v30 }
 0x22a   : > { %v1729_v33 = vpop.f32.mrf.mxu1 }
 0x22b   : > { %v4648_v57 = vadd.f32 %v1729_v33, %v4524_v34 }
 0x22d   : > { %3017 = vmatmul.msk.bf16.gmra.mxu1 %vm1224_vm0, %v4314_v31  ;;  %2121 = vmatmul.bf16.gmra.mxu2 %v1947_v7  ;;  %v1804_v31 = vpop.f32.mrf.mxu3  ;;  %v1853_v34 = vpop.f32.mrf.mxu0  ;;  %v1751_v7 = vadd.f32 %v4569_v32, %v4564_v41  ;;  %v1756_v41 = vadd.f32 %v4585_v16, %v4580_v44  ;;  %v1761_v16 = vadd.f32 %v4601_v40, %v4596_v46  ;;  %v3291_v46 = vld [vmem:[%s4776_s5 + $0x20] sm:$0xff] }
 0x22e   : > { %v1768_v44 = vpop.f32.mrf.mxu2  ;;  %2260 = vmatpush.bf16.msra.mxu0 %v3291_v46 }
 0x22f   : > { %v1800_v39 = vadd.f32 %v1799_v43, %v1751_v7  ;;  %v1805_v51 = vadd.f32 %v1804_v31, %v1756_v41 }
 0x231   : > { %v1849_v9 = vadd.f32 %v1848_v8, %v1800_v39  ;;  %v1854_v0 = vadd.f32 %v1853_v34, %v1805_v51 }
 0x232   : > { %v4655_v45 = vpop.f32.mrf.mxu1 }
 0x235   : > { %v1807_v27 = vpop.f32.mrf.mxu3  ;;  %v1856_v22 = vpop.f32.mrf.mxu0 }
 0x236   : > { %v1808_v33 = vadd.f32 %v1807_v27, %v4593_v6  ;;  %v1770_v28 = vpop.f32.mrf.mxu2 }
 0x238   : > { %v1857_v17 = vadd.f32 %v1856_v22, %v1808_v33 }
 0x23a   : > { %v1734_v18 = vpop.f32.mrf.mxu1 }
 0x23b   : > { %v4658_v61 = vadd.f32 %v1734_v18, %v4546_v20 }
 0x23d   : > { %3018 = vmatmul.msk.bf16.gmra.mxu1 %vm1224_vm0, %v4363_v48  ;;  %2126 = vmatmul.bf16.gmra.mxu2 %v1949_v25  ;;  %v1798_v48 = vadd.f32 %v1797_v36, %v4561_v42  ;;  %v1809_v3 = vpop.f32.mrf.mxu3  ;;  %v1858_v32 = vpop.f32.mrf.mxu0 }
 0x23e   : > { %v1810_v43 = vadd.f32 %v1809_v3, %v1761_v16  ;;  %v1773_v27 = vpop.f32.mrf.mxu2 }
 0x23f   : > { %v1847_v62 = vadd.f32 %v1846_v21, %v1798_v48  ;;  %v1766_v48 = vadd.f32 %v1765_v54, %v4612_v24  ;;  %v1774_v33 = vadd.f32 %v1773_v27, %v4633_v14  ;;  %v3288_v27 = vld [vmem:[%s4776_s5 + $0x8] sm:$0xff] }
 0x240   : > { %v1859_v18 = vadd.f32 %v1858_v32, %v1810_v43 }
 0x242   : > { %v4665_v23 = vpop.f32.mrf.mxu1 }
 0x245   : > { %v1812_v19 = vpop.f32.mrf.mxu3  ;;  %v1861_v49 = vpop.f32.mrf.mxu0 }
 0x246   : > { %v1813_v39 = vadd.f32 %v1812_v19, %v4609_v12  ;;  %v1775_v24 = vpop.f32.mrf.mxu2  ;;  %v3290_v12 = vld [vmem:[%s4776_s5 + $0x18] sm:$0xff] }
 0x247   : > { %2261 = vmatpush.bf16.msra.mxu0 %v3290_v12 }
 0x24a   : > { %v1895_v20 = vpop.f32.mrf.mxu1 }
 0x24b   : > { %v1896_v26 = vadd.f32 %v1895_v20, %v1847_v62 }
 0x24d   : > { %v1814_v37 = vpop.f32.mrf.mxu3  ;;  %v1863_v8 = vpop.f32.mrf.mxu0 }
 0x24e   : > { %v1815_v22 = vadd.f32 %v1814_v37, %v1766_v48 }
 0x252   : > { %v1897_v25 = vpop.f32.mrf.mxu1 }
 0x253   : > { %v1898_v56 = vadd.f32 %v1897_v25, %v1849_v9  ;;  %v1624_v9 = vadd.f32 %v4480_v63, %v4383_v2  ;;  %v1862_v25 = vadd.f32 %v1861_v49, %v1813_v39  ;;  %v1769_v63 = vadd.f32 %v1768_v44, %v4618_v5 }
 0x255   : > { %v1936_v59 = vpack.c.bf16 %v1898_v56, %v1896_v26  ;;  %v1817_v7 = vpop.f32.mrf.mxu3  ;;  %v1866_v40 = vpop.f32.mrf.mxu0  ;;  %v1864_v26 = vadd.f32 %v1863_v8, %v1815_v22  ;;  %v1673_v41 = vadd.f32 %v4473_v29, %v1624_v9  ;;  %v1629_v29 = vadd.f32 %v4511_v11, %v4383_v2  ;;  %v3287_v22 = vld [vmem:[%s4776_s5] sm:$0xff] }
 0x257   : > { %2140 = vmatmul.bf16.vlgmr.msra.gmra.mxu3 %v1936_v59  ;;  %v1722_v54 = vadd.f32 %v4625_v60, %v1673_v41  ;;  %v1678_v16 = vadd.f32 %v4504_v1, %v1629_v29  ;;  %v1634_v1 = vadd.f32 %v4531_v10, %v4383_v2 }
 0x259   : > { %v1771_v30 = vadd.f32 %v1770_v28, %v1722_v54  ;;  %v1727_v44 = vadd.f32 %v4642_v53, %v1678_v16 }
 0x25a   : > { %v1900_v42 = vpop.f32.mrf.mxu1 }
 0x25b   : > { %v1901_v52 = vadd.f32 %v1900_v42, %v1852_v4  ;;  %v1818_v4 = vadd.f32 %v1817_v7, %v1769_v63  ;;  %v1776_v11 = vadd.f32 %v1775_v24, %v1727_v44 }
 0x25d   : > { %v1819_v62 = vpop.f32.mrf.mxu3  ;;  %v1868_v56 = vpop.f32.mrf.mxu0 }
 0x262   : > { %v1902_v35 = vpop.f32.mrf.mxu1 }
 0x263   : > { %v1903_v47 = vadd.f32 %v1902_v35, %v1854_v0  ;;  %v1820_v0 = vadd.f32 %v1819_v62, %v1771_v30  ;;  %v1778_v35 = vpop.f32.mrf.mxu2 }
 0x264   : > { %v1779_v39 = vadd.f32 %v1778_v35, %v4648_v57 }
 0x265   : > { %v1938_v36 = vpack.c.bf16 %v1903_v47, %v1901_v52  ;;  %v1822_v42 = vpop.f32.mrf.mxu3  ;;  %v1871_v19 = vpop.f32.mrf.mxu0  ;;  %v1867_v52 = vadd.f32 %v1866_v40, %v1818_v4  ;;  %v1869_v60 = vadd.f32 %v1868_v56, %v1820_v0  ;;  %v1683_v40 = vadd.f32 %v4533_v15, %v1634_v1 }
 0x266   : > { %v1639_v56 = vadd.f32 %v4630_v55, %v4383_v2 }
 0x267   : > { %2145 = vmatmul.bf16.gmra.mxu3 %v1938_v36 }
 0x268   : > { %v1688_v24 = vadd.f32 %v4640_v13, %v1639_v56 }
 0x26a   : > { %v1905_v21 = vpop.f32.mrf.mxu1  ;;  %v1737_v12 = vadd.f32 %v4665_v23, %v1688_v24 }
 0x26b   : > { %v1906_v34 = vadd.f32 %v1905_v21, %v1857_v17  ;;  %v3289_v21 = vld [vmem:[%s4776_s5 + $0x10] sm:$0xff]  ;;  %v1780_v43 = vpop.f32.mrf.mxu2 }
 0x26c   : > { %2262 = vmatpush.bf16.msra.mxu0 %v3289_v21 }
 0x26d   : > { %v1824_v47 = vpop.f32.mrf.mxu3  ;;  %v1873_v5 = vpop.f32.mrf.mxu0 }
 0x26e   : > { %v1825_v28 = vadd.f32 %v1824_v47, %v1776_v11 }
 0x270   : > { %v1874_v53 = vadd.f32 %v1873_v5, %v1825_v28  ;;  %2263 = vmatpush.bf16.msra.mxu0 %v3288_v27 }
 0x272   : > { %v1907_v31 = vpop.f32.mrf.mxu1 }
 0x273   : > { %v1908_v38 = vadd.f32 %v1907_v31, %v1859_v18  ;;  %v1823_v18 = vadd.f32 %v1822_v42, %v1774_v33  ;;  %v1783_v46 = vpop.f32.mrf.mxu2 }
 0x274   : > { %2264 = vmatpush.bf16.msra.mxu0 %v3287_v22  ;;  %v1784_v63 = vadd.f32 %v1783_v46, %v4658_v61  ;;  %v4725_v61 = vld [vmem:[%s4775_s4] ss:$0 sm:$0xff] }
 0x275   : > { %v1940_v20 = vpack.c.bf16 %v1908_v38, %v1906_v34  ;;  %v1827_v17 = vpop.f32.mrf.mxu3  ;;  %v1876_v31 = vpop.f32.mrf.mxu0  ;;  %v1872_v34 = vadd.f32 %v1871_v19, %v1823_v18 }
 0x276   : > { %v1828_v15 = vadd.f32 %v1827_v17, %v1779_v39 }
 0x277   : > { %2150 = vmatmul.bf16.gmra.mxu3 %v1940_v20 }
 0x27a   : > { %v1910_v6 = vpop.f32.mrf.mxu1 }
 0x27b   : > { %v1911_v3 = vadd.f32 %v1910_v6, %v1862_v25  ;;  %v1732_v6 = vadd.f32 %v4655_v45, %v1683_v40 }
 0x27d   : > { %v1829_v48 = vpop.f32.mrf.mxu3  ;;  %v1781_v10 = vadd.f32 %v1780_v43, %v1732_v6  ;;  %v1878_v62 = vpop.f32.mrf.mxu0 }
 0x27f   : > { %v1830_v25 = vadd.f32 %v1829_v48, %v1781_v10 }
 0x282   : > { %v1912_v59 = vpop.f32.mrf.mxu1 }
 0x283   : > { %v1913_v58 = vadd.f32 %v1912_v59, %v1864_v26  ;;  %v1785_v26 = vpop.f32.mrf.mxu2  ;;  %v1877_v59 = vadd.f32 %v1876_v31, %v1828_v15 }
 0x284   : > { %v1786_v30 = vadd.f32 %v1785_v26, %v1737_v12 }
 0x285   : > { %v1942_v32 = vpack.c.bf16 %v1913_v58, %v1911_v3  ;;  %v1832_v45 = vpop.f32.mrf.mxu3  ;;  %v1879_v3 = vadd.f32 %v1878_v62, %v1830_v25 }
 0x286   : > { %v1833_v4 = vadd.f32 %v1832_v45, %v1784_v63 }
 0x287   : > { %2155 = vmatmul.bf16.gmra.mxu3 %v1942_v32  ;;  %v1881_v32 = vpop.f32.mrf.mxu0 }
 0x288   : > { %v1882_v0 = vadd.f32 %v1881_v32, %v1833_v4 }
 0x28a   : > { %v1915_v51 = vpop.f32.mrf.mxu1 }
 0x28b   : > { %v1916_v36 = vadd.f32 %v1915_v51, %v1867_v52  ;;  %v2092_v42 = vpop.f32.mrf.mxu2 }
 0x28c   : > { %v2093_v16 = vadd.f32 %v4725_v61, %v2092_v42 }
 0x28d   : > { %v1834_v51 = vpop.f32.mrf.mxu3 }
 0x28e   : > { %v1835_v2 = vadd.f32 %v1834_v51, %v1786_v30 }
 0x28f   : > { %v1883_v55 = vpop.f32.mrf.mxu0 }
 0x290   : > { %v1884_v35 = vadd.f32 %v1883_v55, %v1835_v2 }
 0x292   : > { %v1917_v49 = vpop.f32.mrf.mxu1 }
 0x293   : > { %v1918_v50 = vadd.f32 %v1917_v49, %v1869_v60  ;;  %v2094_v29 = vpop.f32.mrf.mxu2 }
 0x295   : > { %v1944_v37 = vpack.c.bf16 %v1918_v50, %v1916_v36 }
 0x297   : > { %2160 = vmatmul.bf16.gmra.mxu3 %v1944_v37  ;;  %v2095_v37 = vadd.f32 %v4725_v61, %v2094_v29 }
 0x29a   : > { %v1920_v8 = vpop.f32.mrf.mxu1 }
 0x29b   : > { %v1921_v7 = vadd.f32 %v1920_v8, %v1872_v34  ;;  %v2097_v49 = vpop.f32.mrf.mxu2 }
 0x29c   : > { %v2098_v8 = vadd.f32 %v4725_v61, %v2097_v49 }
 0x2a2   : > { %v1922_v38 = vpop.f32.mrf.mxu1 }
 0x2a3   : > { %v1923_v20 = vadd.f32 %v1922_v38, %v1874_v53  ;;  %v2099_v23 = vpop.f32.mrf.mxu2 }
 0x2a4   : > { %v2100_v17 = vadd.f32 %v4725_v61, %v2099_v23 }
 0x2a5   : > { %v1946_v14 = vpack.c.bf16 %v1923_v20, %v1921_v7 }
 0x2a7   : > { %2165 = vmatmul.bf16.gmra.mxu3 %v1946_v14 }
 0x2aa   : > { %v1925_v9 = vpop.f32.mrf.mxu1 }
 0x2ab   : > { %v1926_v57 = vadd.f32 %v1925_v9, %v1877_v59  ;;  %v2102_v50 = vpop.f32.mrf.mxu2 }
 0x2ac   : > { %v2103_v7 = vadd.f32 %v4725_v61, %v2102_v50 }
 0x2b2   : > { %v1927_v58 = vpop.f32.mrf.mxu1 }
 0x2b3   : > { %v1928_v41 = vadd.f32 %v1927_v58, %v1879_v3  ;;  %v2104_v11 = vpop.f32.mrf.mxu2 }
 0x2b4   : > { %v2105_v20 = vadd.f32 %v4725_v61, %v2104_v11 }
 0x2b5   : > { %v1948_v54 = vpack.c.bf16 %v1928_v41, %v1926_v57 }
 0x2b7   : > { %2170 = vmatmul.bf16.gmra.mxu3 %v1948_v54 }
 0x2ba   : > { %v1930_v19 = vpop.f32.mrf.mxu1 }
 0x2bb   : > { %v1931_v60 = vadd.f32 %v1930_v19, %v1882_v0  ;;  %v2107_v1 = vpop.f32.mrf.mxu2 }
 0x2bc   : > { %v2108_v39 = vadd.f32 %v4725_v61, %v2107_v1 }
 0x2c2   : > { %v1932_v52 = vpop.f32.mrf.mxu1 }
 0x2c3   : > { %v1933_v47 = vadd.f32 %v1932_v52, %v1884_v35  ;;  %v2109_v38 = vpop.f32.mrf.mxu2 }
 0x2c4   : > { %v2110_v10 = vadd.f32 %v4725_v61, %v2109_v38 }
 0x2c5   : > { %v1950_v13 = vpack.c.bf16 %v1933_v47, %v1931_v60 }
 0x2c7   : > { %2175 = vmatmul.bf16.gmra.mxu3 %v1950_v13 }
 0x2cb   : > { %v2112_v6 = vpop.f32.mrf.mxu2 }
 0x2cc   : > { %v2113_v56 = vadd.f32 %v4725_v61, %v2112_v6 }
 0x2d3   : > { %v2114_v22 = vpop.f32.mrf.mxu2 }
 0x2d4   : > { %v2115_v59 = vadd.f32 %v4725_v61, %v2114_v22 }
 0x2da   : > { %v2141_v36 = vpop.f32.mrf.mxu3 }
 0x2db   : > { %v2142_v44 = vadd.f32 %v2141_v36, %v2093_v16  ;;  %v2117_v45 = vpop.f32.mrf.mxu2 }
 0x2dc   : > { %v2118_v12 = vadd.f32 %v4725_v61, %v2117_v45 }
 0x2e2   : > { %v2143_v5 = vpop.f32.mrf.mxu3 }
 0x2e3   : > { %v2144_v21 = vadd.f32 %v2143_v5, %v2095_v37  ;;  %v2119_v32 = vpop.f32.mrf.mxu2 }
 0x2e4   : > { %v2120_v42 = vadd.f32 %v4725_v61, %v2119_v32 }
 0x2e5   : > { %v2181_v33 = vpack.c.bf16 %v2144_v21, %v2142_v44  ;;  %v3329_v44 = vld [vmem:[%s4777_s6] ss:$0 sm:$0xff] }
 0x2e7   : > { %2265 = vmatmul.bf16.vlgmr.msra.gmra.mxu0 %v2181_v33 }
 0x2ea   : > { %v2146_v43 = vpop.f32.mrf.mxu3 }
 0x2eb   : > { %v2147_v28 = vadd.f32 %v2146_v43, %v2098_v8  ;;  %v2122_v54 = vpop.f32.mrf.mxu2 }
 0x2ec   : > { %v2123_v55 = vadd.f32 %v4725_v61, %v2122_v54 }
 0x2f2   : > { %v2148_v18 = vpop.f32.mrf.mxu3 }
 0x2f3   : > { %v2149_v31 = vadd.f32 %v2148_v18, %v2100_v17  ;;  %v2124_v4 = vpop.f32.mrf.mxu2 }
 0x2f4   : > { %v2125_v0 = vadd.f32 %v4725_v61, %v2124_v4 }
 0x2f5   : > { %v2182_v34 = vpack.c.bf16 %v2149_v31, %v2147_v28 }
 0x2f7   : > { %2270 = vmatmul.bf16.gmra.mxu0 %v2182_v34 }
 0x2fa   : > { %v2151_v53 = vpop.f32.mrf.mxu3 }
 0x2fb   : > { %v2152_v40 = vadd.f32 %v2151_v53, %v2103_v7  ;;  %v2127_v60 = vpop.f32.mrf.mxu2 }
 0x2fc   : > { %v2128_v23 = vadd.f32 %v4725_v61, %v2127_v60 }
 0x302   : > { %v2153_v46 = vpop.f32.mrf.mxu3 }
 0x303   : > { %v2154_v14 = vadd.f32 %v2153_v46, %v2105_v20  ;;  %v2129_v49 = vpop.f32.mrf.mxu2 }
 0x304   : > { %v2130_v36 = vadd.f32 %v4725_v61, %v2129_v49 }
 0x305   : > { %v2183_v48 = vpack.c.bf16 %v2154_v14, %v2152_v40 }
 0x307   : > { %2275 = vmatmul.bf16.gmra.mxu0 %v2183_v48 }
 0x30a   : > { %v2156_v27 = vpop.f32.mrf.mxu3 }
 0x30b   : > { %v2157_v9 = vadd.f32 %v2156_v27, %v2108_v39 }
 0x312   : > { %v2158_v62 = vpop.f32.mrf.mxu3 }
 0x313   : > { %v2159_v15 = vadd.f32 %v2158_v62, %v2110_v10 }
 0x315   : > { %v2184_v25 = vpack.c.bf16 %v2159_v15, %v2157_v9 }
 0x317   : > { %2280 = vmatmul.bf16.gmra.mxu0 %v2184_v25 }
 0x31a   : > { %v2161_v26 = vpop.f32.mrf.mxu3 }
 0x31b   : > { %v2162_v58 = vadd.f32 %v2161_v26, %v2113_v56 }
 0x322   : > { %v2163_v3 = vpop.f32.mrf.mxu3 }
 0x323   : > { %v2164_v57 = vadd.f32 %v2163_v3, %v2115_v59 }
 0x325   : > { %v2185_v41 = vpack.c.bf16 %v2164_v57, %v2162_v58 }
 0x327   : > { %2285 = vmatmul.bf16.gmra.mxu0 %v2185_v41 }
 0x32a   : > { %v2166_v24 = vpop.f32.mrf.mxu3 }
 0x32b   : > { %v2167_v30 = vadd.f32 %v2166_v24, %v2118_v12 }
 0x332   : > { %v2168_v63 = vpop.f32.mrf.mxu3 }
 0x333   : > { %v2169_v51 = vadd.f32 %v2168_v63, %v2120_v42 }
 0x335   : > { %v2186_v19 = vpack.c.bf16 %v2169_v51, %v2167_v30 }
 0x337   : > { %2290 = vmatmul.bf16.gmra.mxu0 %v2186_v19 }
 0x33a   : > { %v2171_v2 = vpop.f32.mrf.mxu3 }
 0x33b   : > { %v2172_v29 = vadd.f32 %v2171_v2, %v2123_v55 }
 0x342   : > { %v2173_v35 = vpop.f32.mrf.mxu3 }
 0x343   : > { %v2174_v52 = vadd.f32 %v2173_v35, %v2125_v0 }
 0x345   : > { %v2187_v47 = vpack.c.bf16 %v2174_v52, %v2172_v29 }
 0x347   : > { %2295 = vmatmul.bf16.gmra.mxu0 %v2187_v47 }
 0x34a   : > { %v2176_v13 = vpop.f32.mrf.mxu3 }
 0x34b   : > { %v2177_v16 = vadd.f32 %v2176_v13, %v2128_v23 }
 0x352   : > { %v2178_v50 = vpop.f32.mrf.mxu3 }
 0x353   : > { %v2179_v37 = vadd.f32 %v2178_v50, %v2130_v36 }
 0x355   : > { %v2188_v5 = vpack.c.bf16 %v2179_v37, %v2177_v16 }
 0x357   : > { %2300 = vmatmul.bf16.gmra.mxu0 %v2188_v5 }
 0x364   : > { %v2266_v61 = vpop.f32.mrf.mxu0 }
 0x365   : > { %v2267_v21 = vadd.f32 %v3329_v44, %v2266_v61 }
 0x367   : > { %2306 = vst [vmem:[%s4750_s11] sm:$0xff] %v2267_v21 }
 0x36c   : > { %v2268_v33 = vpop.f32.mrf.mxu0 }
 0x36d   : > { %v2269_v11 = vadd.f32 %v3329_v44, %v2268_v33 }
 0x36f   : > { %2307 = vst [vmem:[%s4750_s11 + $0x8] sm:$0xff] %v2269_v11 }
 0x374   : > { %v2271_v43 = vpop.f32.mrf.mxu0 }
 0x375   : > { %v2272_v8 = vadd.f32 %v3329_v44, %v2271_v43 }
 0x377   : > { %2308 = vst [vmem:[%s4750_s11 + $0x10] sm:$0xff] %v2272_v8 }
 0x37c   : > { %v2273_v17 = vpop.f32.mrf.mxu0 }
 0x37d   : > { %v2274_v18 = vadd.f32 %v3329_v44, %v2273_v17 }
 0x37f   : > { %2309 = vst [vmem:[%s4750_s11 + $0x18] sm:$0xff] %v2274_v18 }
 0x384   : > { %v2276_v28 = vpop.f32.mrf.mxu0 }
 0x385   : > { %v2277_v31 = vadd.f32 %v3329_v44, %v2276_v28 }
 0x387   : > { %2310 = vst [vmem:[%s4750_s11 + $0x20] sm:$0xff] %v2277_v31 }
 0x38c   : > { %v2278_v1 = vpop.f32.mrf.mxu0 }
 0x38d   : > { %v2279_v34 = vadd.f32 %v3329_v44, %v2278_v1 }
 0x38f   : > { %2311 = vst [vmem:[%s4750_s11 + $0x28] sm:$0xff] %v2279_v34 }
 0x394   : > { %v2281_v53 = vpop.f32.mrf.mxu0 }
 0x395   : > { %v2282_v38 = vadd.f32 %v3329_v44, %v2281_v53 }
 0x397   : > { %2312 = vst [vmem:[%s4750_s11 + $0x30] sm:$0xff] %v2282_v38 }
 0x39c   : > { %v2283_v7 = vpop.f32.mrf.mxu0 }
 0x39d   : > { %v2284_v20 = vadd.f32 %v3329_v44, %v2283_v7 }
 0x39f   : > { %2313 = vst [vmem:[%s4750_s11 + $0x38] sm:$0xff] %v2284_v20 }
 0x3a4   : > { %v2286_v46 = vpop.f32.mrf.mxu0 }
 0x3a5   : > { %v2287_v40 = vadd.f32 %v3329_v44, %v2286_v46 }
 0x3a7   : > { %2314 = vst [vmem:[%s4750_s11 + $0x40] sm:$0xff] %v2287_v40 }
 0x3ac   : > { %v2288_v14 = vpop.f32.mrf.mxu0 }
 0x3ad   : > { %v2289_v48 = vadd.f32 %v3329_v44, %v2288_v14 }
 0x3af   : > { %2315 = vst [vmem:[%s4750_s11 + $0x48] sm:$0xff] %v2289_v48 }
 0x3b4   : > { %v2291_v6 = vpop.f32.mrf.mxu0 }
 0x3b5   : > { %v2292_v27 = vadd.f32 %v3329_v44, %v2291_v6 }
 0x3b7   : > { %2316 = vst [vmem:[%s4750_s11 + $0x50] sm:$0xff] %v2292_v27 }
 0x3bc   : > { %v2293_v39 = vpop.f32.mrf.mxu0 }
 0x3bd   : > { %v2294_v10 = vadd.f32 %v3329_v44, %v2293_v39 }
 0x3bf   : > { %2317 = vst [vmem:[%s4750_s11 + $0x58] sm:$0xff] %v2294_v10 }
 0x3c4   : > { %v2296_v22 = vpop.f32.mrf.mxu0 }
 0x3c5   : > { %v2297_v62 = vadd.f32 %v3329_v44, %v2296_v22 }
 0x3c7   : > { %2318 = vst [vmem:[%s4750_s11 + $0x60] sm:$0xff] %v2297_v62 }
 0x3cc   : > { %v2298_v9 = vpop.f32.mrf.mxu0 }
 0x3cd   : > { %v2299_v15 = vadd.f32 %v3329_v44, %v2298_v9 }
 0x3cf   : > { %2319 = vst [vmem:[%s4750_s11 + $0x68] sm:$0xff] %v2299_v15 }
 0x3d4   : > { %v2301_v25 = vpop.f32.mrf.mxu0 }
 0x3d5   : > { %v2302_v26 = vadd.f32 %v3329_v44, %v2301_v25 }
 0x3d7   : > { %2320 = vst [vmem:[%s4750_s11 + $0x70] sm:$0xff] %v2302_v26 }
 0x3dc   : > { %v2303_v45 = vpop.f32.mrf.mxu0 }
 0x3dd   : > { %v2304_v56 = vadd.f32 %v3329_v44, %v2303_v45 }
 0x3df   : > { %2321 = vst [vmem:[%s4750_s11 + $0x78] sm:$0xff] %v2304_v56 }
 0x3e0 PF: > { %s17_s24 = sadd.s32 1, %s3336_s24  }
 0x3e1   : > { %p14_p4 = scmp.ge.s32.totalorder %s17_s24, 4  }
 0x3e3   :  { %16 = sbr.rel (!%p14_p4) target bundleno = 1 (0x1), region = 78 }

</bundles_post_ra>
